<compile_context>
chip_gen: v6e
topology: v6e:2x2x1
jax: 0.10.0
libtpu: 0.0.40
codegen_flags: <defaults>
</compile_context>

<pallas_src>
import jax
import jax.numpy as jnp
from jax.experimental import pallas as pl
from jax.experimental.pallas import tpu as pltpu

# ---------------- small synthetic config (shapes consistent with the module) --------------
BATCH = 2
SEQ = 8
VOCAB = 100
HIDDEN = 128          # stands in for bert_hidden_dim = 1024
MLP_HIDDEN = 128      # stands in for MLP_hidden_dim = 1024
NUM_HEADS = 2
HEAD_DIM = HIDDEN // NUM_HEADS
INTERMEDIATE = 256
NUM_LAYERS = 2
NUM_LABELS = 3        # tagset_size
LABEL_PAD = 128       # pad the tiny label dim to a full 128-lane store; slice outside
PAD_TOKEN_ID = 1
LN_EPS = 1e-5


# ----------------------------------- fused Pallas kernel ----------------------------------
def _roberta_kernel(emb_ref, bias_ref, eg_ref, eb_ref,
                    qkv_w_ref, qkv_b_ref, ao_w_ref, ao_b_ref,
                    aln_g_ref, aln_b_ref, inter_w_ref, inter_b_ref,
                    out_w_ref, out_b_ref, oln_g_ref, oln_b_ref,
                    pool_w_ref, pool_b_ref, cd_w_ref, cd_b_ref,
                    co_w_ref, co_b_ref,
                    o_ref, h_ref):
    """grid = (batch, layer).  h_ref: VMEM scratch [SEQ, HIDDEN] f32 carried across layers."""
    layer = pl.program_id(1)

    def mm(x, w_bf16):
        # bf16 MXU matmul with f32 accumulation
        return jnp.dot(x.astype(jnp.bfloat16), w_bf16, preferred_element_type=jnp.float32)

    def layer_norm(x, g, b):
        mu = jnp.mean(x, axis=-1, keepdims=True)
        xc = x - mu
        var = jnp.mean(xc * xc, axis=-1, keepdims=True)
        return xc * jax.lax.rsqrt(var + LN_EPS) * g + b

    # ---- layer 0: embeddings LayerNorm into the VMEM-resident hidden state ----
    @pl.when(layer == 0)
    def _():
        h_ref[...] = layer_norm(emb_ref[0], eg_ref[...], eb_ref[...])

    # ---- encoder layer `layer` (weights selected by the grid index_map) ----
    h = h_ref[...]                                           # [S, H] f32

    # fused Q/K/V projection: one [H, 3H] matmul
    qkv = mm(h, qkv_w_ref[0]) + qkv_b_ref[0]                 # [S, 3H] f32

    bias_row = bias_ref[0]                                   # [1, S] (-10000 on padded keys)
    scale = 1.0 / (HEAD_DIM ** 0.5)

    # multi-head attention; heads split/merged in-kernel, output projection fused per head
    attn_out = ao_b_ref[0]                                   # [1, H], broadcasts to [S, H]
    for hd in range(NUM_HEADS):
        c = hd * HEAD_DIM
        q = qkv[:, c:c + HEAD_DIM]
        k = qkv[:, HIDDEN + c:HIDDEN + c + HEAD_DIM]
        v = qkv[:, 2 * HIDDEN + c:2 * HIDDEN + c + HEAD_DIM]
        s = jax.lax.dot_general(
            q.astype(jnp.bfloat16), k.astype(jnp.bfloat16),
            (((1,), (1,)), ((), ())),
            preferred_element_type=jnp.float32) * scale      # [S, S]
        s = s + bias_row
        s = s - jnp.max(s, axis=-1, keepdims=True)
        p = jnp.exp(s)
        p = p * pl.reciprocal(jnp.sum(p, axis=-1, keepdims=True), approx=True)
        ctx_hd = mm(p, v.astype(jnp.bfloat16))               # [S, Dh] f32
        # fold head merge into the output projection: ctx_hd @ W_o[c:c+Dh, :]
        attn_out = attn_out + mm(ctx_hd, ao_w_ref[0, c:c + HEAD_DIM, :])

    h = layer_norm(attn_out + h, aln_g_ref[0], aln_b_ref[0])

    # feed-forward (GELU fused with both projections)
    inter = mm(h, inter_w_ref[0]) + inter_b_ref[0]           # [S, I]
    # TODO(synk): tanh-approximate GELU (exact erf not available in-kernel)
    inter = 0.5 * inter * (1.0 + jnp.tanh(
        0.7978845608028654 * (inter + 0.044715 * inter * inter * inter)))
    ff = mm(inter, out_w_ref[0]) + out_b_ref[0]              # [S, H]
    h = layer_norm(ff + h, oln_g_ref[0], oln_b_ref[0])
    h_ref[...] = h

    # ---- last layer: pooler + classification head, single lane-dense [1, 128] store ----
    @pl.when(layer == NUM_LAYERS - 1)
    def _():
        first = h[0:1, :]                                    # <s> token, [1, H]
        pooled = jnp.tanh(mm(first, pool_w_ref[...]) + pool_b_ref[...])     # roberta pooler
        x = jnp.tanh(mm(pooled, cd_w_ref[...]) + cd_b_ref[...])             # cls dense + tanh
        logits = mm(x, co_w_ref[...]) + co_b_ref[...]        # [1, LABEL_PAD]
        o_ref[0] = logits


def roberta_for_sequence_classification(params, input_ids, input_mask):
    B, S = input_ids.shape
    H = HIDDEN

    # ---- embeddings (gathers: plain-JAX glue) ----
    mask_i = (input_ids != PAD_TOKEN_ID).astype(jnp.int32)
    position_ids = jnp.cumsum(mask_i, axis=1) * mask_i + PAD_TOKEN_ID   # RoBERTa position ids
    emb = (params["word_emb"][input_ids]
           + params["pos_emb"][position_ids]
           + params["type_emb"][jnp.zeros_like(input_ids)])             # [B, S, H] f32

    # extended attention mask bias: (1 - mask) * -10000, one row per batch
    mask_bias = ((1.0 - input_mask.astype(jnp.float32)) * -10000.0).reshape(B, 1, S)

    def wspec(shape):   # per-layer stacked weight: block (1, *shape), indexed by layer
        return pl.BlockSpec((1,) + shape, lambda b, l: (l, 0, 0))

    def cspec(shape):   # constant weight: full block, VMEM-resident across the grid
        nd = len(shape)
        return pl.BlockSpec(shape, lambda b, l, _nd=nd: (0,) * _nd)

    out = pl.pallas_call(
        _roberta_kernel,
        out_shape=jax.ShapeDtypeStruct((B, 1, LABEL_PAD), jnp.float32),
        grid=(B, NUM_LAYERS),
        in_specs=[
            pl.BlockSpec((1, S, H), lambda b, l: (b, 0, 0)),        # embeddings
            pl.BlockSpec((1, 1, S), lambda b, l: (b, 0, 0)),        # attention mask bias
            cspec((1, H)), cspec((1, H)),                           # embedding LN
            wspec((H, 3 * H)), wspec((1, 3 * H)),                   # fused QKV
            wspec((H, H)), wspec((1, H)),                           # attn output proj
            wspec((1, H)), wspec((1, H)),                           # attn LN
            wspec((H, INTERMEDIATE)), wspec((1, INTERMEDIATE)),     # intermediate
            wspec((INTERMEDIATE, H)), wspec((1, H)),                # ffn output
            wspec((1, H)), wspec((1, H)),                           # output LN
            cspec((H, H)), cspec((1, H)),                           # pooler
            cspec((H, MLP_HIDDEN)), cspec((1, MLP_HIDDEN)),         # cls dense
            cspec((MLP_HIDDEN, LABEL_PAD)), cspec((1, LABEL_PAD)),  # cls out (lane-padded)
        ],
        out_specs=pl.BlockSpec((1, 1, LABEL_PAD), lambda b, l: (b, 0, 0)),
        scratch_shapes=[pltpu.VMEM((S, H), jnp.float32)],
        compiler_params=pltpu.CompilerParams(
            dimension_semantics=("parallel", "arbitrary")),
    )(emb, mask_bias, params["emb_ln_g"], params["emb_ln_b"],
      params["qkv_w"], params["qkv_b"],
      params["ao_w"], params["ao_b"],
      params["attn_ln_g"], params["attn_ln_b"],
      params["inter_w"], params["inter_b"],
      params["out_w"], params["out_b"],
      params["out_ln_g"], params["out_ln_b"],
      params["pool_w"], params["pool_b"],
      params["cls_dense_w"], params["cls_dense_b"],
      params["cls_out_w"], params["cls_out_b"])

    return out[:, 0, :NUM_LABELS]                                    # [B, NUM_LABELS]


# --------------------------------- parameter construction ---------------------------------
def init_params(key):
    keys = iter(jax.random.split(key, 64))

    def dense(fan_in, fan_out):
        w = 0.02 * jax.random.normal(next(keys), (fan_in, fan_out), jnp.float32)
        b = jnp.zeros((fan_out,), jnp.float32)
        return w, b

    p = {}
    p["word_emb"] = 0.02 * jax.random.normal(next(keys), (VOCAB, HIDDEN), jnp.float32)
    p["pos_emb"] = 0.02 * jax.random.normal(
        next(keys), (SEQ + PAD_TOKEN_ID + 2, HIDDEN), jnp.float32)
    p["type_emb"] = 0.02 * jax.random.normal(next(keys), (1, HIDDEN), jnp.float32)
    p["emb_ln_g"] = jnp.ones((1, HIDDEN), jnp.float32)
    p["emb_ln_b"] = jnp.zeros((1, HIDDEN), jnp.float32)

    qkv_w, qkv_b, ao_w, ao_b = [], [], [], []
    aln_g, aln_b, inter_w, inter_b = [], [], [], []
    out_w, out_b, oln_g, oln_b = [], [], [], []
    for _ in range(NUM_LAYERS):
        qw, qb = dense(HIDDEN, HIDDEN)
        kw, kb = dense(HIDDEN, HIDDEN)
        vw, vb = dense(HIDDEN, HIDDEN)
        qkv_w.append(jnp.concatenate([qw, kw, vw], axis=1))          # [H, 3H]
        qkv_b.append(jnp.concatenate([qb, kb, vb])[None, :])         # [1, 3H]
        w, b = dense(HIDDEN, HIDDEN)
        ao_w.append(w); ao_b.append(b[None, :])
        aln_g.append(jnp.ones((1, HIDDEN), jnp.float32))
        aln_b.append(jnp.zeros((1, HIDDEN), jnp.float32))
        w, b = dense(HIDDEN, INTERMEDIATE)
        inter_w.append(w); inter_b.append(b[None, :])
        w, b = dense(INTERMEDIATE, HIDDEN)
        out_w.append(w); out_b.append(b[None, :])
        oln_g.append(jnp.ones((1, HIDDEN), jnp.float32))
        oln_b.append(jnp.zeros((1, HIDDEN), jnp.float32))

    stack = lambda xs: jnp.stack(xs, axis=0)
    p["qkv_w"] = stack(qkv_w).astype(jnp.bfloat16)
    p["qkv_b"] = stack(qkv_b)
    p["ao_w"] = stack(ao_w).astype(jnp.bfloat16)
    p["ao_b"] = stack(ao_b)
    p["attn_ln_g"] = stack(aln_g)
    p["attn_ln_b"] = stack(aln_b)
    p["inter_w"] = stack(inter_w).astype(jnp.bfloat16)
    p["inter_b"] = stack(inter_b)
    p["out_w"] = stack(out_w).astype(jnp.bfloat16)
    p["out_b"] = stack(out_b)
    p["out_ln_g"] = stack(oln_g)
    p["out_ln_b"] = stack(oln_b)

    w, b = dense(HIDDEN, HIDDEN)
    p["pool_w"] = w.astype(jnp.bfloat16); p["pool_b"] = b[None, :]
    w, b = dense(HIDDEN, MLP_HIDDEN)
    p["cls_dense_w"] = w.astype(jnp.bfloat16); p["cls_dense_b"] = b[None, :]
    w, b = dense(MLP_HIDDEN, NUM_LABELS)
    w_pad = jnp.zeros((MLP_HIDDEN, LABEL_PAD), jnp.float32).at[:, :NUM_LABELS].set(w)
    b_pad = jnp.zeros((1, LABEL_PAD), jnp.float32).at[0, :NUM_LABELS].set(b)
    p["cls_out_w"] = w_pad.astype(jnp.bfloat16)
    p["cls_out_b"] = b_pad
    return p


# ------------------------------------------ main -------------------------------------------
if __name__ == "__main__":
    key = jax.random.PRNGKey(0)
    k_param, k_ids = jax.random.split(key)

    params = init_params(k_param)

    # deterministic inputs: <s>=0 at position 0, random non-pad tokens elsewhere, full mask
    body = jax.random.randint(k_ids, (BATCH, SEQ - 1), 3, VOCAB, dtype=jnp.int32)
    input_ids = jnp.concatenate([jnp.zeros((BATCH, 1), jnp.int32), body], axis=1)  # [2, 8]
    input_mask = jnp.ones((BATCH, SEQ), jnp.float32)                                # [2, 8]

    fwd = jax.jit(lambda ids, mask: roberta_for_sequence_classification(params, ids, mask))
    scores = fwd(input_ids, input_mask)
    jax.block_until_ready(scores)

    assert scores.shape == (BATCH, NUM_LABELS)
    assert bool(jnp.all(jnp.isfinite(scores)))
    print("KERNEL_OK")
</pallas_src>

<mosaic_0001>
module attributes {stable_mosaic.version = 11 : i64} {
  func.func @_roberta_kernel(%arg0: i32, %arg1: i32, %arg2: memref<1x8x128xf32, #tpu.memory_space<vmem>>, %arg3: memref<1x1x8xf32, #tpu.memory_space<vmem>>, %arg4: memref<1x128xf32, #tpu.memory_space<vmem>>, %arg5: memref<1x128xf32, #tpu.memory_space<vmem>>, %arg6: memref<1x128x384xbf16, #tpu.memory_space<vmem>>, %arg7: memref<1x1x384xf32, #tpu.memory_space<vmem>>, %arg8: memref<1x128x128xbf16, #tpu.memory_space<vmem>>, %arg9: memref<1x1x128xf32, #tpu.memory_space<vmem>>, %arg10: memref<1x1x128xf32, #tpu.memory_space<vmem>>, %arg11: memref<1x1x128xf32, #tpu.memory_space<vmem>>, %arg12: memref<1x128x256xbf16, #tpu.memory_space<vmem>>, %arg13: memref<1x1x256xf32, #tpu.memory_space<vmem>>, %arg14: memref<1x256x128xbf16, #tpu.memory_space<vmem>>, %arg15: memref<1x1x128xf32, #tpu.memory_space<vmem>>, %arg16: memref<1x1x128xf32, #tpu.memory_space<vmem>>, %arg17: memref<1x1x128xf32, #tpu.memory_space<vmem>>, %arg18: memref<128x128xbf16, #tpu.memory_space<vmem>>, %arg19: memref<1x128xf32, #tpu.memory_space<vmem>>, %arg20: memref<128x128xbf16, #tpu.memory_space<vmem>>, %arg21: memref<1x128xf32, #tpu.memory_space<vmem>>, %arg22: memref<128x128xbf16, #tpu.memory_space<vmem>>, %arg23: memref<1x128xf32, #tpu.memory_space<vmem>>, %arg24: memref<1x1x128xf32, #tpu.memory_space<vmem>>, %arg25: memref<8x128xf32, #tpu.memory_space<vmem>>) attributes {dimension_semantics = [#tpu.dimension_semantics<parallel>, #tpu.dimension_semantics<arbitrary>], iteration_bounds = array<i64: 2, 2>, scalar_prefetch = 0 : i64, scratch_operands = 1 : i64, tpu.core_type = #tpu.core_type<tc>, window_params = [{transform_indices = @transform_0, window_bounds = array<i64: 1, 8, 128>}, {transform_indices = @transform_1, window_bounds = array<i64: 1, 1, 8>}, {pipeline_mode = #tpu.pipeline_mode<synchronous>, transform_indices = @transform_2, window_bounds = array<i64: 1, 128>}, {pipeline_mode = #tpu.pipeline_mode<synchronous>, transform_indices = @transform_3, window_bounds = array<i64: 1, 128>}, {transform_indices = @transform_4, window_bounds = array<i64: 1, 128, 384>}, {transform_indices = @transform_5, window_bounds = array<i64: 1, 1, 384>}, {transform_indices = @transform_6, window_bounds = array<i64: 1, 128, 128>}, {transform_indices = @transform_7, window_bounds = array<i64: 1, 1, 128>}, {transform_indices = @transform_8, window_bounds = array<i64: 1, 1, 128>}, {transform_indices = @transform_9, window_bounds = array<i64: 1, 1, 128>}, {transform_indices = @transform_10, window_bounds = array<i64: 1, 128, 256>}, {transform_indices = @transform_11, window_bounds = array<i64: 1, 1, 256>}, {transform_indices = @transform_12, window_bounds = array<i64: 1, 256, 128>}, {transform_indices = @transform_13, window_bounds = array<i64: 1, 1, 128>}, {transform_indices = @transform_14, window_bounds = array<i64: 1, 1, 128>}, {transform_indices = @transform_15, window_bounds = array<i64: 1, 1, 128>}, {pipeline_mode = #tpu.pipeline_mode<synchronous>, transform_indices = @transform_16, window_bounds = array<i64: 128, 128>}, {pipeline_mode = #tpu.pipeline_mode<synchronous>, transform_indices = @transform_17, window_bounds = array<i64: 1, 128>}, {pipeline_mode = #tpu.pipeline_mode<synchronous>, transform_indices = @transform_18, window_bounds = array<i64: 128, 128>}, {pipeline_mode = #tpu.pipeline_mode<synchronous>, transform_indices = @transform_19, window_bounds = array<i64: 1, 128>}, {pipeline_mode = #tpu.pipeline_mode<synchronous>, transform_indices = @transform_20, window_bounds = array<i64: 128, 128>}, {pipeline_mode = #tpu.pipeline_mode<synchronous>, transform_indices = @transform_21, window_bounds = array<i64: 1, 128>}, {transform_indices = @transform_22, window_bounds = array<i64: 1, 1, 128>}]} {
    %c0_i32 = arith.constant 0 : i32
    %0 = arith.cmpi eq, %arg1, %c0_i32 : i32
    %1 = arith.extui %0 : i1 to i32
    %c0_i32_0 = arith.constant 0 : i32
    %2 = arith.cmpi ne, %1, %c0_i32_0 : i32
    scf.if %2 {
      %c0_74 = arith.constant 0 : index
      %c0_75 = arith.constant 0 : index
      %c0_76 = arith.constant 0 : index
      %156 = vector.load %arg2[%c0_74, %c0_75, %c0_76] : memref<1x8x128xf32, #tpu.memory_space<vmem>>, vector<1x8x128xf32>
      %157 = vector.shape_cast %156 : vector<1x8x128xf32> to vector<8x128xf32>
      %c0_77 = arith.constant 0 : index
      %c0_78 = arith.constant 0 : index
      %158 = vector.load %arg4[%c0_77, %c0_78] : memref<1x128xf32, #tpu.memory_space<vmem>>, vector<1x128xf32>
      %c0_79 = arith.constant 0 : index
      %c0_80 = arith.constant 0 : index
      %159 = vector.load %arg5[%c0_79, %c0_80] : memref<1x128xf32, #tpu.memory_space<vmem>>, vector<1x128xf32>
      %cst_81 = arith.constant dense<0.000000e+00> : vector<8xf32>
      %160 = vector.multi_reduction <add>, %157, %cst_81 [1] : vector<8x128xf32> to vector<8xf32>
      %161 = vector.shape_cast %160 : vector<8xf32> to vector<8x1xf32>
      %cst_82 = arith.constant 1.280000e+02 : f32
      %162 = vector.broadcast %cst_82 : f32 to vector<8x1xf32>
      %163 = arith.divf %161, %162 : vector<8x1xf32>
      %164 = vector.broadcast %163 : vector<8x1xf32> to vector<8x128xf32>
      %165 = arith.subf %157, %164 : vector<8x128xf32>
      %166 = arith.mulf %165, %165 : vector<8x128xf32>
      %cst_83 = arith.constant dense<0.000000e+00> : vector<8xf32>
      %167 = vector.multi_reduction <add>, %166, %cst_83 [1] : vector<8x128xf32> to vector<8xf32>
      %168 = vector.shape_cast %167 : vector<8xf32> to vector<8x1xf32>
      %cst_84 = arith.constant 1.280000e+02 : f32
      %169 = vector.broadcast %cst_84 : f32 to vector<8x1xf32>
      %170 = arith.divf %168, %169 : vector<8x1xf32>
      %cst_85 = arith.constant 9.99999974E-6 : f32
      %171 = vector.broadcast %cst_85 : f32 to vector<8x1xf32>
      %172 = arith.addf %170, %171 : vector<8x1xf32>
      %173 = math.rsqrt %172 : vector<8x1xf32>
      %174 = vector.broadcast %173 : vector<8x1xf32> to vector<8x128xf32>
      %175 = arith.mulf %165, %174 : vector<8x128xf32>
      %176 = vector.broadcast %158 : vector<1x128xf32> to vector<8x128xf32>
      %177 = arith.mulf %175, %176 : vector<8x128xf32>
      %178 = vector.broadcast %159 : vector<1x128xf32> to vector<8x128xf32>
      %179 = arith.addf %177, %178 : vector<8x128xf32>
      %c0_86 = arith.constant 0 : index
      %c0_87 = arith.constant 0 : index
      %180 = vector.load %arg25[%c0_86, %c0_87] : memref<8x128xf32, #tpu.memory_space<vmem>>, vector<8x128xf32>
      tpu.vector_store %arg25[%c0_86, %c0_87], %179 {strides = array<i32>} : memref<8x128xf32, #tpu.memory_space<vmem>>, vector<8x128xf32>,
    } else {
    }
    %c0 = arith.constant 0 : index
    %c0_1 = arith.constant 0 : index
    %3 = vector.load %arg25[%c0, %c0_1] : memref<8x128xf32, #tpu.memory_space<vmem>>, vector<8x128xf32>
    %c0_2 = arith.constant 0 : index
    %c0_3 = arith.constant 0 : index
    %c0_4 = arith.constant 0 : index
    %4 = vector.load %arg6[%c0_2, %c0_3, %c0_4] : memref<1x128x384xbf16, #tpu.memory_space<vmem>>, vector<1x128x384xbf16>
    %5 = vector.shape_cast %4 : vector<1x128x384xbf16> to vector<128x384xbf16>
    %6 = arith.truncf %3 : vector<8x128xf32> to vector<8x128xbf16>
    %cst = arith.constant dense<0.000000e+00> : vector<8x384xf32>
    %7 = tpu.matmul %6, %5, %cst {dimension_numbers = #tpu.dot_dimension_numbers<[1], [0], [0], [1], [0, 0, 1, 1], [], []>} : vector<8x128xbf16>, vector<128x384xbf16>, vector<8x384xf32> -> vector<8x384xf32>
    %c0_5 = arith.constant 0 : index
    %c0_6 = arith.constant 0 : index
    %c0_7 = arith.constant 0 : index
    %8 = vector.load %arg7[%c0_5, %c0_6, %c0_7] : memref<1x1x384xf32, #tpu.memory_space<vmem>>, vector<1x1x384xf32>
    %9 = vector.shape_cast %8 : vector<1x1x384xf32> to vector<1x384xf32>
    %10 = vector.broadcast %9 : vector<1x384xf32> to vector<8x384xf32>
    %11 = arith.addf %7, %10 : vector<8x384xf32>
    %c0_8 = arith.constant 0 : index
    %c0_9 = arith.constant 0 : index
    %c0_10 = arith.constant 0 : index
    %12 = vector.load %arg3[%c0_8, %c0_9, %c0_10] : memref<1x1x8xf32, #tpu.memory_space<vmem>>, vector<1x1x8xf32>
    %13 = vector.shape_cast %12 : vector<1x1x8xf32> to vector<1x8xf32>
    %c0_11 = arith.constant 0 : index
    %c0_12 = arith.constant 0 : index
    %c0_13 = arith.constant 0 : index
    %14 = vector.load %arg9[%c0_11, %c0_12, %c0_13] : memref<1x1x128xf32, #tpu.memory_space<vmem>>, vector<1x1x128xf32>
    %15 = vector.shape_cast %14 : vector<1x1x128xf32> to vector<1x128xf32>
    %16 = vector.extract_strided_slice %11 {offsets = [0, 0], sizes = [8, 64], strides = [1, 1]} : vector<8x384xf32> to vector<8x64xf32>
    %17 = vector.extract_strided_slice %11 {offsets = [0, 128], sizes = [8, 64], strides = [1, 1]} : vector<8x384xf32> to vector<8x64xf32>
    %18 = vector.extract_strided_slice %11 {offsets = [0, 256], sizes = [8, 64], strides = [1, 1]} : vector<8x384xf32> to vector<8x64xf32>
    %19 = arith.truncf %16 : vector<8x64xf32> to vector<8x64xbf16>
    %20 = arith.truncf %17 : vector<8x64xf32> to vector<8x64xbf16>
    %cst_14 = arith.constant dense<0.000000e+00> : vector<8x8xf32>
    %21 = tpu.matmul %19, %20, %cst_14 {dimension_numbers = #tpu.dot_dimension_numbers<[1], [1], [0], [0], [0, 0, 1, 0], [], []>} : vector<8x64xbf16>, vector<8x64xbf16>, vector<8x8xf32> -> vector<8x8xf32>
    %cst_15 = arith.constant 1.250000e-01 : f32
    %22 = vector.broadcast %cst_15 : f32 to vector<8x8xf32>
    %23 = arith.mulf %21, %22 : vector<8x8xf32>
    %24 = vector.broadcast %13 : vector<1x8xf32> to vector<8x8xf32>
    %25 = arith.addf %23, %24 : vector<8x8xf32>
    %cst_16 = arith.constant dense<0xFF800000> : vector<8xf32>
    %26 = vector.multi_reduction <maximumf>, %25, %cst_16 [1] : vector<8x8xf32> to vector<8xf32>
    %27 = vector.shape_cast %26 : vector<8xf32> to vector<8x1xf32>
    %28 = vector.broadcast %27 : vector<8x1xf32> to vector<8x8xf32>
    %29 = arith.subf %25, %28 : vector<8x8xf32>
    %30 = math.exp %29 : vector<8x8xf32>
    %cst_17 = arith.constant dense<0.000000e+00> : vector<8xf32>
    %31 = vector.multi_reduction <add>, %30, %cst_17 [1] : vector<8x8xf32> to vector<8xf32>
    %32 = vector.shape_cast %31 : vector<8xf32> to vector<8x1xf32>
    %33 = tpu.reciprocal %32 {approx = true} : vector<8x1xf32> -> vector<8x1xf32>
    %34 = vector.broadcast %33 : vector<8x1xf32> to vector<8x8xf32>
    %35 = arith.mulf %30, %34 : vector<8x8xf32>
    %36 = arith.truncf %18 : vector<8x64xf32> to vector<8x64xbf16>
    %37 = arith.truncf %35 : vector<8x8xf32> to vector<8x8xbf16>
    %cst_18 = arith.constant dense<0.000000e+00> : vector<8x64xf32>
    %38 = tpu.matmul %37, %36, %cst_18 {dimension_numbers = #tpu.dot_dimension_numbers<[1], [0], [0], [1], [0, 0, 1, 1], [], []>} : vector<8x8xbf16>, vector<8x64xbf16>, vector<8x64xf32> -> vector<8x64xf32>
    %c0_19 = arith.constant 0 : index
    %c0_20 = arith.constant 0 : index
    %c0_21 = arith.constant 0 : index
    %39 = vector.load %arg8[%c0_19, %c0_20, %c0_21] : memref<1x128x128xbf16, #tpu.memory_space<vmem>>, vector<1x64x128xbf16>
    %40 = vector.shape_cast %39 : vector<1x64x128xbf16> to vector<64x128xbf16>
    %41 = arith.truncf %38 : vector<8x64xf32> to vector<8x64xbf16>
    %cst_22 = arith.constant dense<0.000000e+00> : vector<8x128xf32>
    %42 = tpu.matmul %41, %40, %cst_22 {dimension_numbers = #tpu.dot_dimension_numbers<[1], [0], [0], [1], [0, 0, 1, 1], [], []>} : vector<8x64xbf16>, vector<64x128xbf16>, vector<8x128xf32> -> vector<8x128xf32>
    %43 = vector.broadcast %15 : vector<1x128xf32> to vector<8x128xf32>
    %44 = arith.addf %43, %42 : vector<8x128xf32>
    %45 = vector.extract_strided_slice %11 {offsets = [0, 64], sizes = [8, 64], strides = [1, 1]} : vector<8x384xf32> to vector<8x64xf32>
    %46 = vector.extract_strided_slice %11 {offsets = [0, 192], sizes = [8, 64], strides = [1, 1]} : vector<8x384xf32> to vector<8x64xf32>
    %47 = vector.extract_strided_slice %11 {offsets = [0, 320], sizes = [8, 64], strides = [1, 1]} : vector<8x384xf32> to vector<8x64xf32>
    %48 = arith.truncf %45 : vector<8x64xf32> to vector<8x64xbf16>
    %49 = arith.truncf %46 : vector<8x64xf32> to vector<8x64xbf16>
    %cst_23 = arith.constant dense<0.000000e+00> : vector<8x8xf32>
    %50 = tpu.matmul %48, %49, %cst_23 {dimension_numbers = #tpu.dot_dimension_numbers<[1], [1], [0], [0], [0, 0, 1, 0], [], []>} : vector<8x64xbf16>, vector<8x64xbf16>, vector<8x8xf32> -> vector<8x8xf32>
    %cst_24 = arith.constant 1.250000e-01 : f32
    %51 = vector.broadcast %cst_24 : f32 to vector<8x8xf32>
    %52 = arith.mulf %50, %51 : vector<8x8xf32>
    %53 = vector.broadcast %13 : vector<1x8xf32> to vector<8x8xf32>
    %54 = arith.addf %52, %53 : vector<8x8xf32>
    %cst_25 = arith.constant dense<0xFF800000> : vector<8xf32>
    %55 = vector.multi_reduction <maximumf>, %54, %cst_25 [1] : vector<8x8xf32> to vector<8xf32>
    %56 = vector.shape_cast %55 : vector<8xf32> to vector<8x1xf32>
    %57 = vector.broadcast %56 : vector<8x1xf32> to vector<8x8xf32>
    %58 = arith.subf %54, %57 : vector<8x8xf32>
    %59 = math.exp %58 : vector<8x8xf32>
    %cst_26 = arith.constant dense<0.000000e+00> : vector<8xf32>
    %60 = vector.multi_reduction <add>, %59, %cst_26 [1] : vector<8x8xf32> to vector<8xf32>
    %61 = vector.shape_cast %60 : vector<8xf32> to vector<8x1xf32>
    %62 = tpu.reciprocal %61 {approx = true} : vector<8x1xf32> -> vector<8x1xf32>
    %63 = vector.broadcast %62 : vector<8x1xf32> to vector<8x8xf32>
    %64 = arith.mulf %59, %63 : vector<8x8xf32>
    %65 = arith.truncf %47 : vector<8x64xf32> to vector<8x64xbf16>
    %66 = arith.truncf %64 : vector<8x8xf32> to vector<8x8xbf16>
    %cst_27 = arith.constant dense<0.000000e+00> : vector<8x64xf32>
    %67 = tpu.matmul %66, %65, %cst_27 {dimension_numbers = #tpu.dot_dimension_numbers<[1], [0], [0], [1], [0, 0, 1, 1], [], []>} : vector<8x8xbf16>, vector<8x64xbf16>, vector<8x64xf32> -> vector<8x64xf32>
    %c0_28 = arith.constant 0 : index
    %c64 = arith.constant 64 : index
    %c0_29 = arith.constant 0 : index
    %68 = vector.load %arg8[%c0_28, %c64, %c0_29] : memref<1x128x128xbf16, #tpu.memory_space<vmem>>, vector<1x64x128xbf16>
    %69 = vector.shape_cast %68 : vector<1x64x128xbf16> to vector<64x128xbf16>
    %70 = arith.truncf %67 : vector<8x64xf32> to vector<8x64xbf16>
    %cst_30 = arith.constant dense<0.000000e+00> : vector<8x128xf32>
    %71 = tpu.matmul %70, %69, %cst_30 {dimension_numbers = #tpu.dot_dimension_numbers<[1], [0], [0], [1], [0, 0, 1, 1], [], []>} : vector<8x64xbf16>, vector<64x128xbf16>, vector<8x128xf32> -> vector<8x128xf32>
    %72 = arith.addf %44, %71 : vector<8x128xf32>
    %73 = arith.addf %72, %3 : vector<8x128xf32>
    %c0_31 = arith.constant 0 : index
    %c0_32 = arith.constant 0 : index
    %c0_33 = arith.constant 0 : index
    %74 = vector.load %arg10[%c0_31, %c0_32, %c0_33] : memref<1x1x128xf32, #tpu.memory_space<vmem>>, vector<1x1x128xf32>
    %75 = vector.shape_cast %74 : vector<1x1x128xf32> to vector<1x128xf32>
    %c0_34 = arith.constant 0 : index
    %c0_35 = arith.constant 0 : index
    %c0_36 = arith.constant 0 : index
    %76 = vector.load %arg11[%c0_34, %c0_35, %c0_36] : memref<1x1x128xf32, #tpu.memory_space<vmem>>, vector<1x1x128xf32>
    %77 = vector.shape_cast %76 : vector<1x1x128xf32> to vector<1x128xf32>
    %cst_37 = arith.constant dense<0.000000e+00> : vector<8xf32>
    %78 = vector.multi_reduction <add>, %73, %cst_37 [1] : vector<8x128xf32> to vector<8xf32>
    %79 = vector.shape_cast %78 : vector<8xf32> to vector<8x1xf32>
    %cst_38 = arith.constant 1.280000e+02 : f32
    %80 = vector.broadcast %cst_38 : f32 to vector<8x1xf32>
    %81 = arith.divf %79, %80 : vector<8x1xf32>
    %82 = vector.broadcast %81 : vector<8x1xf32> to vector<8x128xf32>
    %83 = arith.subf %73, %82 : vector<8x128xf32>
    %84 = arith.mulf %83, %83 : vector<8x128xf32>
    %cst_39 = arith.constant dense<0.000000e+00> : vector<8xf32>
    %85 = vector.multi_reduction <add>, %84, %cst_39 [1] : vector<8x128xf32> to vector<8xf32>
    %86 = vector.shape_cast %85 : vector<8xf32> to vector<8x1xf32>
    %cst_40 = arith.constant 1.280000e+02 : f32
    %87 = vector.broadcast %cst_40 : f32 to vector<8x1xf32>
    %88 = arith.divf %86, %87 : vector<8x1xf32>
    %cst_41 = arith.constant 9.99999974E-6 : f32
    %89 = vector.broadcast %cst_41 : f32 to vector<8x1xf32>
    %90 = arith.addf %88, %89 : vector<8x1xf32>
    %91 = math.rsqrt %90 : vector<8x1xf32>
    %92 = vector.broadcast %91 : vector<8x1xf32> to vector<8x128xf32>
    %93 = arith.mulf %83, %92 : vector<8x128xf32>
    %94 = vector.broadcast %75 : vector<1x128xf32> to vector<8x128xf32>
    %95 = arith.mulf %93, %94 : vector<8x128xf32>
    %96 = vector.broadcast %77 : vector<1x128xf32> to vector<8x128xf32>
    %97 = arith.addf %95, %96 : vector<8x128xf32>
    %c0_42 = arith.constant 0 : index
    %c0_43 = arith.constant 0 : index
    %c0_44 = arith.constant 0 : index
    %98 = vector.load %arg12[%c0_42, %c0_43, %c0_44] : memref<1x128x256xbf16, #tpu.memory_space<vmem>>, vector<1x128x256xbf16>
    %99 = vector.shape_cast %98 : vector<1x128x256xbf16> to vector<128x256xbf16>
    %100 = arith.truncf %97 : vector<8x128xf32> to vector<8x128xbf16>
    %cst_45 = arith.constant dense<0.000000e+00> : vector<8x256xf32>
    %101 = tpu.matmul %100, %99, %cst_45 {dimension_numbers = #tpu.dot_dimension_numbers<[1], [0], [0], [1], [0, 0, 1, 1], [], []>} : vector<8x128xbf16>, vector<128x256xbf16>, vector<8x256xf32> -> vector<8x256xf32>
    %c0_46 = arith.constant 0 : index
    %c0_47 = arith.constant 0 : index
    %c0_48 = arith.constant 0 : index
    %102 = vector.load %arg13[%c0_46, %c0_47, %c0_48] : memref<1x1x256xf32, #tpu.memory_space<vmem>>, vector<1x1x256xf32>
    %103 = vector.shape_cast %102 : vector<1x1x256xf32> to vector<1x256xf32>
    %104 = vector.broadcast %103 : vector<1x256xf32> to vector<8x256xf32>
    %105 = arith.addf %101, %104 : vector<8x256xf32>
    %cst_49 = arith.constant 5.000000e-01 : f32
    %106 = vector.broadcast %cst_49 : f32 to vector<8x256xf32>
    %107 = arith.mulf %106, %105 : vector<8x256xf32>
    %cst_50 = arith.constant 4.471500e-02 : f32
    %108 = vector.broadcast %cst_50 : f32 to vector<8x256xf32>
    %109 = arith.mulf %108, %105 : vector<8x256xf32>
    %110 = arith.mulf %109, %105 : vector<8x256xf32>
    %111 = arith.mulf %110, %105 : vector<8x256xf32>
    %112 = arith.addf %105, %111 : vector<8x256xf32>
    %cst_51 = arith.constant 0.797884583 : f32
    %113 = vector.broadcast %cst_51 : f32 to vector<8x256xf32>
    %114 = arith.mulf %113, %112 : vector<8x256xf32>
    %115 = math.tanh %114 : vector<8x256xf32>
    %cst_52 = arith.constant 1.000000e+00 : f32
    %116 = vector.broadcast %cst_52 : f32 to vector<8x256xf32>
    %117 = arith.addf %116, %115 : vector<8x256xf32>
    %118 = arith.mulf %107, %117 : vector<8x256xf32>
    %c0_53 = arith.constant 0 : index
    %c0_54 = arith.constant 0 : index
    %c0_55 = arith.constant 0 : index
    %119 = vector.load %arg14[%c0_53, %c0_54, %c0_55] : memref<1x256x128xbf16, #tpu.memory_space<vmem>>, vector<1x256x128xbf16>
    %120 = vector.shape_cast %119 : vector<1x256x128xbf16> to vector<256x128xbf16>
    %121 = arith.truncf %118 : vector<8x256xf32> to vector<8x256xbf16>
    %cst_56 = arith.constant dense<0.000000e+00> : vector<8x128xf32>
    %122 = tpu.matmul %121, %120, %cst_56 {dimension_numbers = #tpu.dot_dimension_numbers<[1], [0], [0], [1], [0, 0, 1, 1], [], []>} : vector<8x256xbf16>, vector<256x128xbf16>, vector<8x128xf32> -> vector<8x128xf32>
    %c0_57 = arith.constant 0 : index
    %c0_58 = arith.constant 0 : index
    %c0_59 = arith.constant 0 : index
    %123 = vector.load %arg15[%c0_57, %c0_58, %c0_59] : memref<1x1x128xf32, #tpu.memory_space<vmem>>, vector<1x1x128xf32>
    %124 = vector.shape_cast %123 : vector<1x1x128xf32> to vector<1x128xf32>
    %125 = vector.broadcast %124 : vector<1x128xf32> to vector<8x128xf32>
    %126 = arith.addf %122, %125 : vector<8x128xf32>
    %127 = arith.addf %126, %97 : vector<8x128xf32>
    %c0_60 = arith.constant 0 : index
    %c0_61 = arith.constant 0 : index
    %c0_62 = arith.constant 0 : index
    %128 = vector.load %arg16[%c0_60, %c0_61, %c0_62] : memref<1x1x128xf32, #tpu.memory_space<vmem>>, vector<1x1x128xf32>
    %129 = vector.shape_cast %128 : vector<1x1x128xf32> to vector<1x128xf32>
    %c0_63 = arith.constant 0 : index
    %c0_64 = arith.constant 0 : index
    %c0_65 = arith.constant 0 : index
    %130 = vector.load %arg17[%c0_63, %c0_64, %c0_65] : memref<1x1x128xf32, #tpu.memory_space<vmem>>, vector<1x1x128xf32>
    %131 = vector.shape_cast %130 : vector<1x1x128xf32> to vector<1x128xf32>
    %cst_66 = arith.constant dense<0.000000e+00> : vector<8xf32>
    %132 = vector.multi_reduction <add>, %127, %cst_66 [1] : vector<8x128xf32> to vector<8xf32>
    %133 = vector.shape_cast %132 : vector<8xf32> to vector<8x1xf32>
    %cst_67 = arith.constant 1.280000e+02 : f32
    %134 = vector.broadcast %cst_67 : f32 to vector<8x1xf32>
    %135 = arith.divf %133, %134 : vector<8x1xf32>
    %136 = vector.broadcast %135 : vector<8x1xf32> to vector<8x128xf32>
    %137 = arith.subf %127, %136 : vector<8x128xf32>
    %138 = arith.mulf %137, %137 : vector<8x128xf32>
    %cst_68 = arith.constant dense<0.000000e+00> : vector<8xf32>
    %139 = vector.multi_reduction <add>, %138, %cst_68 [1] : vector<8x128xf32> to vector<8xf32>
    %140 = vector.shape_cast %139 : vector<8xf32> to vector<8x1xf32>
    %cst_69 = arith.constant 1.280000e+02 : f32
    %141 = vector.broadcast %cst_69 : f32 to vector<8x1xf32>
    %142 = arith.divf %140, %141 : vector<8x1xf32>
    %cst_70 = arith.constant 9.99999974E-6 : f32
    %143 = vector.broadcast %cst_70 : f32 to vector<8x1xf32>
    %144 = arith.addf %142, %143 : vector<8x1xf32>
    %145 = math.rsqrt %144 : vector<8x1xf32>
    %146 = vector.broadcast %145 : vector<8x1xf32> to vector<8x128xf32>
    %147 = arith.mulf %137, %146 : vector<8x128xf32>
    %148 = vector.broadcast %129 : vector<1x128xf32> to vector<8x128xf32>
    %149 = arith.mulf %147, %148 : vector<8x128xf32>
    %150 = vector.broadcast %131 : vector<1x128xf32> to vector<8x128xf32>
    %151 = arith.addf %149, %150 : vector<8x128xf32>
    %c0_71 = arith.constant 0 : index
    %c0_72 = arith.constant 0 : index
    %152 = vector.load %arg25[%c0_71, %c0_72] : memref<8x128xf32, #tpu.memory_space<vmem>>, vector<8x128xf32>
    tpu.vector_store %arg25[%c0_71, %c0_72], %151 {strides = array<i32>} : memref<8x128xf32, #tpu.memory_space<vmem>>, vector<8x128xf32>,
    %c1_i32 = arith.constant 1 : i32
    %153 = arith.cmpi eq, %arg1, %c1_i32 : i32
    %154 = arith.extui %153 : i1 to i32
    %c0_i32_73 = arith.constant 0 : i32
    %155 = arith.cmpi ne, %154, %c0_i32_73 : i32
    scf.if %155 {
      %156 = vector.extract_strided_slice %151 {offsets = [0, 0], sizes = [1, 128], strides = [1, 1]} : vector<8x128xf32> to vector<1x128xf32>
      %c0_74 = arith.constant 0 : index
      %c0_75 = arith.constant 0 : index
      %157 = vector.load %arg18[%c0_74, %c0_75] : memref<128x128xbf16, #tpu.memory_space<vmem>>, vector<128x128xbf16>
      %158 = arith.truncf %156 : vector<1x128xf32> to vector<1x128xbf16>
      %cst_76 = arith.constant dense<0.000000e+00> : vector<1x128xf32>
      %159 = tpu.matmul %158, %157, %cst_76 {dimension_numbers = #tpu.dot_dimension_numbers<[1], [0], [0], [1], [0, 0, 1, 1], [], []>} : vector<1x128xbf16>, vector<128x128xbf16>, vector<1x128xf32> -> vector<1x128xf32>
      %c0_77 = arith.constant 0 : index
      %c0_78 = arith.constant 0 : index
      %160 = vector.load %arg19[%c0_77, %c0_78] : memref<1x128xf32, #tpu.memory_space<vmem>>, vector<1x128xf32>
      %161 = arith.addf %159, %160 : vector<1x128xf32>
      %162 = math.tanh %161 : vector<1x128xf32>
      %c0_79 = arith.constant 0 : index
      %c0_80 = arith.constant 0 : index
      %163 = vector.load %arg20[%c0_79, %c0_80] : memref<128x128xbf16, #tpu.memory_space<vmem>>, vector<128x128xbf16>
      %164 = arith.truncf %162 : vector<1x128xf32> to vector<1x128xbf16>
      %cst_81 = arith.constant dense<0.000000e+00> : vector<1x128xf32>
      %165 = tpu.matmul %164, %163, %cst_81 {dimension_numbers = #tpu.dot_dimension_numbers<[1], [0], [0], [1], [0, 0, 1, 1], [], []>} : vector<1x128xbf16>, vector<128x128xbf16>, vector<1x128xf32> -> vector<1x128xf32>
      %c0_82 = arith.constant 0 : index
      %c0_83 = arith.constant 0 : index
      %166 = vector.load %arg21[%c0_82, %c0_83] : memref<1x128xf32, #tpu.memory_space<vmem>>, vector<1x128xf32>
      %167 = arith.addf %165, %166 : vector<1x128xf32>
      %168 = math.tanh %167 : vector<1x128xf32>
      %c0_84 = arith.constant 0 : index
      %c0_85 = arith.constant 0 : index
      %169 = vector.load %arg22[%c0_84, %c0_85] : memref<128x128xbf16, #tpu.memory_space<vmem>>, vector<128x128xbf16>
      %170 = arith.truncf %168 : vector<1x128xf32> to vector<1x128xbf16>
      %cst_86 = arith.constant dense<0.000000e+00> : vector<1x128xf32>
      %171 = tpu.matmul %170, %169, %cst_86 {dimension_numbers = #tpu.dot_dimension_numbers<[1], [0], [0], [1], [0, 0, 1, 1], [], []>} : vector<1x128xbf16>, vector<128x128xbf16>, vector<1x128xf32> -> vector<1x128xf32>
      %c0_87 = arith.constant 0 : index
      %c0_88 = arith.constant 0 : index
      %172 = vector.load %arg23[%c0_87, %c0_88] : memref<1x128xf32, #tpu.memory_space<vmem>>, vector<1x128xf32>
      %173 = arith.addf %171, %172 : vector<1x128xf32>
      %c0_89 = arith.constant 0 : index
      %c0_90 = arith.constant 0 : index
      %c0_91 = arith.constant 0 : index
      %174 = vector.load %arg24[%c0_89, %c0_90, %c0_91] : memref<1x1x128xf32, #tpu.memory_space<vmem>>, vector<1x1x128xf32>
      %175 = vector.shape_cast %174 : vector<1x1x128xf32> to vector<1x128xf32>
      %176 = vector.shape_cast %173 : vector<1x128xf32> to vector<1x1x128xf32>
      tpu.vector_store %arg24[%c0_89, %c0_90, %c0_91], %176 {strides = array<i32>} : memref<1x1x128xf32, #tpu.memory_space<vmem>>, vector<1x1x128xf32>,
    } else {
    }
    return
  }
  func.func @transform_0(%arg0: i32, %arg1: i32) -> (i32, i32, i32) {
    %c0_i32 = arith.constant 0 : i32
    %c0_i32_0 = arith.constant 0 : i32
    %c0_i32_1 = arith.constant 0 : i32
    return %arg0, %c0_i32, %c0_i32_0 : i32, i32, i32
  }
  func.func @transform_1(%arg0: i32, %arg1: i32) -> (i32, i32, i32) {
    %c0_i32 = arith.constant 0 : i32
    %c0_i32_0 = arith.constant 0 : i32
    %c0_i32_1 = arith.constant 0 : i32
    return %arg0, %c0_i32, %c0_i32_0 : i32, i32, i32
  }
  func.func @transform_2(%arg0: i32, %arg1: i32) -> (i32, i32) {
    %c0_i32 = arith.constant 0 : i32
    %c0_i32_0 = arith.constant 0 : i32
    %c0_i32_1 = arith.constant 0 : i32
    return %c0_i32, %c0_i32_0 : i32, i32
  }
  func.func @transform_3(%arg0: i32, %arg1: i32) -> (i32, i32) {
    %c0_i32 = arith.constant 0 : i32
    %c0_i32_0 = arith.constant 0 : i32
    %c0_i32_1 = arith.constant 0 : i32
    return %c0_i32, %c0_i32_0 : i32, i32
  }
  func.func @transform_4(%arg0: i32, %arg1: i32) -> (i32, i32, i32) {
    %c0_i32 = arith.constant 0 : i32
    %c0_i32_0 = arith.constant 0 : i32
    %c0_i32_1 = arith.constant 0 : i32
    return %arg1, %c0_i32, %c0_i32_0 : i32, i32, i32
  }
  func.func @transform_5(%arg0: i32, %arg1: i32) -> (i32, i32, i32) {
    %c0_i32 = arith.constant 0 : i32
    %c0_i32_0 = arith.constant 0 : i32
    %c0_i32_1 = arith.constant 0 : i32
    return %arg1, %c0_i32, %c0_i32_0 : i32, i32, i32
  }
  func.func @transform_6(%arg0: i32, %arg1: i32) -> (i32, i32, i32) {
    %c0_i32 = arith.constant 0 : i32
    %c0_i32_0 = arith.constant 0 : i32
    %c0_i32_1 = arith.constant 0 : i32
    return %arg1, %c0_i32, %c0_i32_0 : i32, i32, i32
  }
  func.func @transform_7(%arg0: i32, %arg1: i32) -> (i32, i32, i32) {
    %c0_i32 = arith.constant 0 : i32
    %c0_i32_0 = arith.constant 0 : i32
    %c0_i32_1 = arith.constant 0 : i32
    return %arg1, %c0_i32, %c0_i32_0 : i32, i32, i32
  }
  func.func @transform_8(%arg0: i32, %arg1: i32) -> (i32, i32, i32) {
    %c0_i32 = arith.constant 0 : i32
    %c0_i32_0 = arith.constant 0 : i32
    %c0_i32_1 = arith.constant 0 : i32
    return %arg1, %c0_i32, %c0_i32_0 : i32, i32, i32
  }
  func.func @transform_9(%arg0: i32, %arg1: i32) -> (i32, i32, i32) {
    %c0_i32 = arith.constant 0 : i32
    %c0_i32_0 = arith.constant 0 : i32
    %c0_i32_1 = arith.constant 0 : i32
    return %arg1, %c0_i32, %c0_i32_0 : i32, i32, i32
  }
  func.func @transform_10(%arg0: i32, %arg1: i32) -> (i32, i32, i32) {
    %c0_i32 = arith.constant 0 : i32
    %c0_i32_0 = arith.constant 0 : i32
    %c0_i32_1 = arith.constant 0 : i32
    return %arg1, %c0_i32, %c0_i32_0 : i32, i32, i32
  }
  func.func @transform_11(%arg0: i32, %arg1: i32) -> (i32, i32, i32) {
    %c0_i32 = arith.constant 0 : i32
    %c0_i32_0 = arith.constant 0 : i32
    %c0_i32_1 = arith.constant 0 : i32
    return %arg1, %c0_i32, %c0_i32_0 : i32, i32, i32
  }
  func.func @transform_12(%arg0: i32, %arg1: i32) -> (i32, i32, i32) {
    %c0_i32 = arith.constant 0 : i32
    %c0_i32_0 = arith.constant 0 : i32
    %c0_i32_1 = arith.constant 0 : i32
    return %arg1, %c0_i32, %c0_i32_0 : i32, i32, i32
  }
  func.func @transform_13(%arg0: i32, %arg1: i32) -> (i32, i32, i32) {
    %c0_i32 = arith.constant 0 : i32
    %c0_i32_0 = arith.constant 0 : i32
    %c0_i32_1 = arith.constant 0 : i32
    return %arg1, %c0_i32, %c0_i32_0 : i32, i32, i32
  }
  func.func @transform_14(%arg0: i32, %arg1: i32) -> (i32, i32, i32) {
    %c0_i32 = arith.constant 0 : i32
    %c0_i32_0 = arith.constant 0 : i32
    %c0_i32_1 = arith.constant 0 : i32
    return %arg1, %c0_i32, %c0_i32_0 : i32, i32, i32
  }
  func.func @transform_15(%arg0: i32, %arg1: i32) -> (i32, i32, i32) {
    %c0_i32 = arith.constant 0 : i32
    %c0_i32_0 = arith.constant 0 : i32
    %c0_i32_1 = arith.constant 0 : i32
    return %arg1, %c0_i32, %c0_i32_0 : i32, i32, i32
  }
  func.func @transform_16(%arg0: i32, %arg1: i32) -> (i32, i32) {
    %c0_i32 = arith.constant 0 : i32
    %c0_i32_0 = arith.constant 0 : i32
    %c0_i32_1 = arith.constant 0 : i32
    return %c0_i32, %c0_i32_0 : i32, i32
  }
  func.func @transform_17(%arg0: i32, %arg1: i32) -> (i32, i32) {
    %c0_i32 = arith.constant 0 : i32
    %c0_i32_0 = arith.constant 0 : i32
    %c0_i32_1 = arith.constant 0 : i32
    return %c0_i32, %c0_i32_0 : i32, i32
  }
  func.func @transform_18(%arg0: i32, %arg1: i32) -> (i32, i32) {
    %c0_i32 = arith.constant 0 : i32
    %c0_i32_0 = arith.constant 0 : i32
    %c0_i32_1 = arith.constant 0 : i32
    return %c0_i32, %c0_i32_0 : i32, i32
  }
  func.func @transform_19(%arg0: i32, %arg1: i32) -> (i32, i32) {
    %c0_i32 = arith.constant 0 : i32
    %c0_i32_0 = arith.constant 0 : i32
    %c0_i32_1 = arith.constant 0 : i32
    return %c0_i32, %c0_i32_0 : i32, i32
  }
  func.func @transform_20(%arg0: i32, %arg1: i32) -> (i32, i32) {
    %c0_i32 = arith.constant 0 : i32
    %c0_i32_0 = arith.constant 0 : i32
    %c0_i32_1 = arith.constant 0 : i32
    return %c0_i32, %c0_i32_0 : i32, i32
  }
  func.func @transform_21(%arg0: i32, %arg1: i32) -> (i32, i32) {
    %c0_i32 = arith.constant 0 : i32
    %c0_i32_0 = arith.constant 0 : i32
    %c0_i32_1 = arith.constant 0 : i32
    return %c0_i32, %c0_i32_0 : i32, i32
  }
  func.func @transform_22(%arg0: i32, %arg1: i32) -> (i32, i32, i32) {
    %c0_i32 = arith.constant 0 : i32
    %c0_i32_0 = arith.constant 0 : i32
    %c0_i32_1 = arith.constant 0 : i32
    return %arg0, %c0_i32, %c0_i32_0 : i32, i32, i32
  }
}

</mosaic_0001>

<bundles_post_ra>
// kernel: _lambda_.1
= control target key start
LH: loop header
LB: loop body
LE: loop exit
PB: predicated region body
PF: predicated region fallthrough
CT: control target
= control target key end

     0   :  { %s4245_s0 = inlined_call_operand.vmem [shape: f32[2,8,128], index: 0, kind: input, shape index: {}]   ;;  %s4246_s1 = inlined_call_operand.vmem [shape: f32[2,1,8], index: 1, kind: input, shape index: {}]   ;;  %s4247_s2 = inlined_call_operand.vmem [shape: f32[1,128], index: 2, kind: input, shape index: {}]   ;;  %s4248_s3 = inlined_call_operand.vmem [shape: f32[1,128], index: 3, kind: input, shape index: {}, may-alias: {3,17,19,21}]   ;;  %s4249_s4 = inlined_call_operand.hbm [shape: bf16[2,128,384], index: 4, kind: input, shape index: {}]   ;;  %s4250_s5 = inlined_call_operand.vmem [shape: f32[2,1,384], index: 5, kind: input, shape index: {}]   ;;  %s4251_s6 = inlined_call_operand.vmem [shape: bf16[2,128,128], index: 6, kind: input, shape index: {}]   ;;  %s4252_s7 = inlined_call_operand.vmem [shape: f32[2,1,128], index: 7, kind: input, shape index: {}, may-alias: {7,9,13,15}]   ;;  %s4253_s8 = inlined_call_operand.vmem [shape: f32[2,1,128], index: 8, kind: input, shape index: {}, may-alias: {8,14}]   ;;  %s4254_s9 = inlined_call_operand.vmem [shape: f32[2,1,128], index: 9, kind: input, shape index: {}, may-alias: {7,9,13,15}]   ;;  %s4255_s10 = inlined_call_operand.vmem [shape: bf16[2,128,256], index: 10, kind: input, shape index: {}]   ;;  %s4256_s11 = inlined_call_operand.vmem [shape: f32[2,1,256], index: 11, kind: input, shape index: {}]   ;;  %s4257_s12 = inlined_call_operand.hbm [shape: bf16[2,256,128], index: 12, kind: input, shape index: {}]   ;;  %s4258_s13 = inlined_call_operand.vmem [shape: f32[2,1,128], index: 13, kind: input, shape index: {}, may-alias: {7,9,13,15}]   ;;  %s4259_s14 = inlined_call_operand.vmem [shape: f32[2,1,128], index: 14, kind: input, shape index: {}, may-alias: {8,14}]   ;;  %s4260_s15 = inlined_call_operand.vmem [shape: f32[2,1,128], index: 15, kind: input, shape index: {}, may-alias: {7,9,13,15}]   ;;  %s4261_s16 = inlined_call_operand.hbm [shape: bf16[128,128], index: 16, kind: input, shape index: {}]   ;;  %s4262_s17 = inlined_call_operand.vmem [shape: f32[1,128], index: 17, kind: input, shape index: {}, may-alias: {3,17,19,21}]   ;;  %s4263_s18 = inlined_call_operand.hbm [shape: bf16[128,128], index: 18, kind: input, shape index: {}]   ;;  %s4264_s19 = inlined_call_operand.vmem [shape: f32[1,128], index: 19, kind: input, shape index: {}, may-alias: {3,17,19,21}]   ;;  %s4265_s20 = inlined_call_operand.hbm [shape: bf16[128,128], index: 20, kind: input, shape index: {}]   ;;  %s4266_s21 = inlined_call_operand.vmem [shape: f32[1,128], index: 21, kind: input, shape index: {}, may-alias: {3,17,19,21}]   ;;  %s4267_s22 = inlined_call_operand.hbm [shape: f32[2,1,128], index: 22, kind: output, shape index: {}]  }
   0x1   :  { %4287 = sst [smem:[#allocation33_spill]] %s4245_s0 }
   0x2   :  { %4288 = sst [smem:[#allocation34_spill]] %s4246_s1 }
   0x3   :  { %4289 = sst [smem:[#allocation35_spill]] %s4247_s2 }
   0x4   :  { %4290 = sst [smem:[#allocation36_spill]] %s4248_s3 }
   0x5   :  { %4291 = sst [smem:[#allocation37_spill]] %s4249_s4 }
   0x6   :  { %4292 = sst [smem:[#allocation38_spill]] %s4250_s5 }
   0x7   :  { %4293 = sst [smem:[#allocation39_spill]] %s4251_s6 }
   0x8   :  { %4294 = sst [smem:[#allocation40_spill]] %s4253_s8 }
   0x9   :  { %4295 = sst [smem:[#allocation41_spill]] %s4254_s9 }
   0xa   :  { %4296 = sst [smem:[#allocation42_spill]] %s4255_s10 }
   0xb   :  { %4297 = sst [smem:[#allocation43_spill]] %s4256_s11 }
   0xc   :  { %4298 = sst [smem:[#allocation44_spill]] %s4257_s12 }
   0xd   :  { %4299 = sst [smem:[#allocation45_spill]] %s4258_s13 }
   0xe   :  { %4300 = sst [smem:[#allocation46_spill]] %s4259_s14 }
   0xf   :  { %4301 = sst [smem:[#allocation47_spill]] %s4260_s15 }
  0x10   :  { %4302 = sst [smem:[#allocation48_spill]] %s4261_s16 }
  0x11   :  { %4303 = sst [smem:[#allocation49_spill]] %s4262_s17 }
  0x12   :  { %4304 = sst [smem:[#allocation50_spill]] %s4263_s18 }
  0x13   :  { %4305 = sst [smem:[#allocation51_spill]] %s4264_s19 }
  0x14   :  { %4306 = sst [smem:[#allocation52_spill]] %s4265_s20 }
  0x15   :  { %4307 = sst [smem:[#allocation53_spill]] %s4266_s21 }
  0x16   :  { %4308 = sst [smem:[#allocation54_spill]] %s4267_s22 }
  0x17   :  { %27 = vsyncpa [#allocation4], 0 }
  0x18   :  { %29 = vsyncpa [#allocation4 + $0x1], 0 }
  0x19   :  { %30 = vsyncpa [#allocation7], 0 }
  0x1a   :  { %32 = vsyncpa [#allocation7 + $0x1], 0 }
  0x1b   :  { %33 = vsyncpa [#allocation10], 0 }
  0x1c   :  { %34 = vsyncpa [#allocation5], 0 }
  0x1d   :  { %36 = vsyncpa [#allocation5 + $0x1], 0  ;;  %s3681_s3 = smov 0   ;;  %s3683_s28 = smov 0  }
  0x1e   :  { %s3685_s29 = smov 0   ;;  %s3687_s30 = smov 0  }
  0x1f   :  { %s3689_s4 = smov 0   ;;  %s3691_s0 = smov 0  }
  0x20   :  { %s3693_s23 = smov 0   ;;  %s3695_s1 = smov 0  }
  0x21   :  { %s3697_s5 = smov 0   ;;  %s3699_s24 = smov 0  }
  0x22   :  { %s3701_s6 = smov 0  }
  0x23 LB: > { %4309 = sst [smem:[#allocation18_spill]] %s3508_s3  ;;  %s3735_s25 = sadd.s32 4294967295, %s3548_s6   ;;  %s3548_s6 = sphi %s3701_s6, %s42_s6   ;;  %s3544_s24 = sphi %s3699_s24, %s4386_s24   ;;  %s3540_s5 = sphi %s3697_s5, %s4385_s5   ;;  %s3536_s1 = sphi %s3695_s1, %s4384_s1   ;;  %s3532_s23 = sphi %s3693_s23, %s4383_s23   ;;  %s3528_s0 = sphi %s3691_s0, %s4382_s0   ;;  %s3524_s4 = sphi %s3689_s4, %s4381_s4   ;;  %s3520_s30 = sphi %s3687_s30, %s4380_s30   ;;  %s3516_s29 = sphi %s3685_s29, %s4389_s29   ;;  %s3512_s28 = sphi %s3683_s28, %s4388_s28   ;;  %s3508_s3 = sphi %s3681_s3, %s4387_s3  }
  0x24   : > { %4310 = sst [smem:[#allocation19_spill]] %s3516_s29  ;;  %s2668_s26 = sadd.s32 4294967294, %s3548_s6  }
  0x25   : > { %4311 = sst [smem:[#allocation20_spill]] %s3524_s4  ;;  %p168_p0 = scmp.ne.s32.totalorder %s3524_s4, %s3520_s30 }
  0x26   : > { %4312 = sst [smem:[#allocation21_spill]] %s3528_s0  ;;  %p4273_p1 = scmp.eq.s32.totalorder %s3735_s25, 0 }
  0x27   : > { %4313 = sst [smem:[#allocation22_spill]] %s3536_s1  ;;  %p603_p2 = scmp.ne.s32.totalorder %s3516_s29, %s3512_s28 }
  0x28   : > { %4314 = sst [smem:[#allocation23_spill]] %s3540_s5  ;;  %p3745_p3 = por %p4273_p1, %p168_p0 }
  0x29   : > { %4315 = sst [smem:[#allocation24_spill]] %s3544_s24  ;;  %p604_p4 = scmp.eq.s32.totalorder %s3735_s25, 3 }
  0x2a   : > { %4316 = sst [smem:[#allocation25_spill]] %s3548_s6  ;;  %p609_p5 = scmp.ne.s32.totalorder %s3512_s28, %s3508_s3 }
  0x2b   : > { %p610_p6 = scmp.eq.s32.totalorder %s2668_s26, 3  ;;  %p3752_p7 = por %p604_p4, %p603_p2 }
  0x2c   : > { %p2669_p8 = scmp.ge.s32.totalorder %s3548_s6, 1  ;;  %p617_p10 = scmp.lt.s32.totalorder %s3548_s6, 5 }
  0x2d   : > { %s4318_s22 = scalar_select %p3752_p7, 1, 0 }
  0x2e   : > { %p3757_p9 = por %p610_p6, %p609_p5  ;;  %p3762_p11 = pnand %p2669_p8, %p617_p10 }
  0x2f   : > { %4319 = sst [smem:[#allocation26_spill]] %s4318_s22  ;;  %s3550_s2 = smov [#allocation8]  }
  0x30   : > { %s4320_s21 = scalar_select %p3757_p9, 1, 0 }
  0x31   : > { %s635_s19 = sshll.u32 %s3550_s2, 4  ;;  %p3026_p12 = pneg %p3762_p11  ;;  %s636_s19 = int_to_ptr.vmem [resolvable:$true] %s635_s19 }
  0x32   : > { %4321 = sst [smem:[#allocation27_spill]] %s4320_s21  ;;  %s3551_s3 = smov [#allocation9]  }
  0x33   : > { %p3770_p13 = pnand %p3026_p12, %p4273_p1  ;;  %s651_s21 = sshll.u32 %s3551_s3, 4  ;;  %s652_s21 = int_to_ptr.vmem [resolvable:$true] %s651_s21 }
  0x34   : > { %s3552_s22 = smov [#allocation11]   ;;  %s3293_s15 = scalar_lea.vmem %s636_s19, 1024 }
  0x35   : > { %s667_s17 = sshll.u32 %s3552_s22, 4  ;;  %p3284_p0 = pneg %p3770_p13  ;;  %s668_s17 = int_to_ptr.vmem [resolvable:$true] %s667_s17 }
  0x36   : > { %p3294_p2 = scmp.ne.s32.totalorder %s636_s19, %s3293_s15  ;;  %p3301_p6 = scmp.lt.s32.totalorder %s636_s19, %s636_s19 }
  0x37   : > { %p3302_p8 = scmp.lt.s32.totalorder %s3293_s15, %s3293_s15 }
  0x38   : > { %p3296_p4 = pnand %p3294_p2, %p3284_p0 }
  0x39   : > { %p3303_p10 = por %p3302_p8, %p3301_p6 }
  0x3a   : > { %p3297_p5 = pneg %p3296_p4 }
  0x3c   : > { %p3304_p12 = pnand %p3303_p10, %p3297_p5 }
  0x3e   : > { %3307 = shalt.err (!%p3304_p12)
}
  0x3f   : > { %s4274_s2 = smov 64   ;;  %s4275_s3 = smov 4  }
  0x40   : > { %s4324_s16 = sld [smem:[#allocation48_spill]]  ;;  %s3319_s13 = scalar_lea.vmem %s652_s21, 1024 }
  0x41   : > { %p3320_p2 = scmp.ne.s32.totalorder %s652_s21, %s3319_s13  ;;  %p3327_p5 = scmp.lt.s32.totalorder %s652_s21, %s652_s21 }
  0x42   : > { %p3328_p8 = scmp.lt.s32.totalorder %s3319_s13, %s3319_s13 }
  0x43   : > { %p3322_p4 = pnand %p3320_p2, %p3284_p0 }
  0x44   : > { %p3329_p10 = por %p3328_p8, %p3327_p5 }
  0x45   : > { %p3323_p6 = pneg %p3322_p4 }
  0x46   : > { %3029 = dma.hbm_to_vmem [thread:$0]  (!%p3770_p13), %s4324_s16, 1024, %s636_s19, [#allocation7], %s4274_s2, %s4274_s2, %s4275_s3  }
  0x47   : > { %p3330_p12 = pnand %p3329_p10, %p3323_p6 }
  0x49   : > { %3333 = shalt.err (!%p3330_p12)
}
  0x4a   : > { %s4325_s18 = sld [smem:[#allocation50_spill]]  ;;  %s3345_s14 = scalar_lea.vmem %s668_s17, 1024 }
  0x4b   : > { %p3346_p1 = scmp.ne.s32.totalorder %s668_s17, %s3345_s14  ;;  %p3353_p5 = scmp.lt.s32.totalorder %s668_s17, %s668_s17 }
  0x4c   : > { %p3354_p6 = scmp.lt.s32.totalorder %s3345_s14, %s3345_s14 }
  0x4d   : > { %p3348_p2 = pnand %p3346_p1, %p3284_p0 }
  0x4e   : > { %p3355_p8 = por %p3354_p6, %p3353_p5 }
  0x4f   : > { %p3349_p4 = pneg %p3348_p2 }
  0x50   : > { %3032 = dma.hbm_to_vmem [thread:$0]  (!%p3770_p13), %s4325_s18, 1024, %s652_s21, [#allocation10], %s4274_s2, %s4274_s2, %s4275_s3  }
  0x51   : > { %p3356_p10 = pnand %p3355_p8, %p3349_p4 }
  0x53   : > { %3359 = shalt.err (!%p3356_p10)
}
  0x54   : > { %s4326_s20 = sld [smem:[#allocation52_spill]]  ;;  %s51_s19 = sadd.s32 1, %s3540_s5 }
  0x55   : > { %p52_p1 = scmp.ge.s32.totalorder %s51_s19, 2  ;;  %s54_s21 = sadd.s32 1, %s3544_s24 }
  0x56   : > { %s155_s26 = sadd.s32 1, %s3528_s0  ;;  %p162_p0 = scmp.ne.s32.totalorder %s3528_s0, %s3524_s4 }
  0x57   : > { %s4391_s19 = smov (%p52_p1, %s51_s19), 0  ;;  %s4393_s21 = smov (!%p52_p1, %s54_s21), %s3544_s24 }
  0x58   : > { %4327 = sst [smem:[#allocation28_spill]] %s4391_s19  ;;  %s152_s22 = ssub.s32 %s3540_s5, %s4391_s19 }
  0x59   : > { %p163_p12 = scmp.eq.s32.totalorder %s3548_s6, 0  ;;  %p56_p2 = scmp.ge.s32.totalorder %s4393_s21, 2 }
  0x5a   : > { %3035 = dma.hbm_to_vmem [thread:$0]  (!%p3770_p13), %s4326_s20, 1024, %s668_s17, [#allocation10], %s4274_s2, %s4274_s2, %s4275_s3  }
  0x5b   : > { %p153_p4 = scmp.eq.s32.totalorder %s152_s22, 0  ;;  %p164_p5 = por %p163_p12, %p162_p0 }
  0x5c   : > { %p3050_p13 = scmp.lt.s32.totalorder %s3548_s6, 4  ;;  %s4395_s21 = smov (%p56_p2, %s4393_s21), 0 }
  0x5d   : > { %4328 = sst [smem:[#allocation29_spill]] %s4395_s21  ;;  %s590_s15 = ssub.s32 %s3544_s24, %s4395_s21 }
  0x5e   : > { %s3824_s17 = scalar_select %p153_p4, %s3528_s0, %s155_s26  }
  0x5f   : > { %s3829_s14 = sand.u32 1, %s3528_s0   ;;  %p591_p6 = scmp.eq.s32.totalorder %s590_s15, 0 }
  0x60   : > { %4329 = sst [smem:[#allocation30_spill]] %s3824_s17  ;;  %s3004_s11 = smul.u32 192, %s3829_s14 }
  0x61   : > { %p3832_p8 = pnand %p3050_p13, %p164_p5  ;;  %s4331_s2 = sadd.s32 1, %s3516_s29 }
  0x62   : > { %s3839_s22 = scalar_select %p591_p6, %s3516_s29, %s4331_s2  }
  0x63   : > { %s3005_s3 = smul.u32 3072, %s3540_s5  ;;  %s701_s16 = scalar_lea.vmem [#allocation3], %s3004_s11 }
  0x64   : > { %4332 = sst [smem:[#allocation31_spill]] %s3839_s22  ;;  %s708_s26 = sshll.u32 %s701_s16, 4  ;;  %s709_s26 = int_to_ptr.vmem [resolvable:$true] %s708_s26 }
  0x65   : > { %s4333_s21 = sld [smem:[#allocation37_spill]]  ;;  %s698_s24 = scalar_lea.sflag [#allocation4], %s3829_s14 }
  0x66   : > { %p3362_p10 = pneg %p3832_p8  ;;  %s3373_s15 = scalar_lea.vmem %s709_s26, 3072 }
  0x67   : > { %p3374_p1 = scmp.ne.s32.totalorder %s709_s26, %s3373_s15  ;;  %s3555_s17 = smov [#allocation3]  }
  0x68   : > { %s3378_s2 = sshll.u32 %s3555_s17, 4  ;;  %s3379_s2 = int_to_ptr.vmem [resolvable:$false] %s3378_s2 }
  0x69   : > { %p3376_p0 = pnand %p3374_p1, %p3362_p10  ;;  %s3380_s0 = scalar_lea.vmem %s3379_s2, 6144 }
  0x6a   : > { %p3381_p2 = scmp.lt.s32.totalorder %s709_s26, %s3379_s2  ;;  %p3382_p4 = scmp.lt.s32.totalorder %s3380_s0, %s3373_s15 }
  0x6b   : > { %s707_s19 = scalar_lea.hbm %s4333_s21, %s3005_s3  ;;  %p3377_p12 = pneg %p3376_p0 }
  0x6c   : > { %p3383_p5 = por %p3382_p4, %p3381_p2 }
  0x6e   : > { %p3384_p13 = pnand %p3383_p5, %p3377_p12 }
  0x70   : > { %3387 = shalt.err (!%p3384_p13)
}
  0x71   : > { %s3556_s16 = smov 192   ;;  %s3557_s18 = smov 12  }
  0x72   : > { %3039 = dma.hbm_to_vmem [thread:$0]  (!%p3832_p8), %s707_s19, 3072, %s709_s26, %s698_s24, %s3556_s16, %s3556_s16, %s3557_s18  }
  0x73   : > { %s766_s20 = sand.u32 1, %s3548_s6   ;;  %s2675_s3 = sshll.u32 %s3829_s14, 7 }
  0x74   : > { %s2797_s21 = sshll.u32 %s3540_s5, 11  ;;  %s770_s17 = scalar_lea.vmem [#allocation6], %s2675_s3 }
  0x75   : > { %s777_s11 = sshll.u32 %s770_s17, 4  ;;  %s4334_s12 = sld [smem:[#allocation44_spill]]  ;;  %s778_s11 = int_to_ptr.vmem [resolvable:$true] %s777_s11 }
  0x76   : > { %s767_s15 = scalar_lea.sflag [#allocation7], %s766_s20  ;;  %s3401_s29 = scalar_lea.vmem %s778_s11, 2048 }
  0x77   : > { %p3402_p6 = scmp.ne.s32.totalorder %s778_s11, %s3401_s29  ;;  %s3558_s10 = smov [#allocation6]  }
  0x78   : > { %s3406_s9 = sshll.u32 %s3558_s10, 4  ;;  %s3407_s9 = int_to_ptr.vmem [resolvable:$false] %s3406_s9 }
  0x79   : > { %p3404_p1 = pnand %p3402_p6, %p3362_p10  ;;  %s3408_s24 = scalar_lea.vmem %s3407_s9, 4096 }
  0x7a   : > { %p3409_p12 = scmp.lt.s32.totalorder %s778_s11, %s3407_s9  ;;  %p3410_p2 = scmp.lt.s32.totalorder %s3408_s24, %s3401_s29 }
  0x7b   : > { %s776_s0 = scalar_lea.hbm %s4334_s12, %s2797_s21  ;;  %p3405_p0 = pneg %p3404_p1 }
  0x7c   : > { %p3411_p4 = por %p3410_p2, %p3409_p12 }
  0x7e   : > { %p3412_p5 = pnand %p3411_p4, %p3405_p0 }
  0x80   : > { %3415 = shalt.err (!%p3412_p5)
}
  0x81   : > { %s4335_s19 = smov 4   ;;  %s4336_s14 = smov 64  }
  0x82   : > { %3042 = dma.hbm_to_vmem [thread:$0]  (!%p3832_p8), %s776_s0, 2048, %s778_s11, %s767_s15, %s4336_s14, %s4336_s14, %s4335_s19  }
  0x83   : > { %807 = sbr.rel (%p3762_p11) target bundleno = 3866 (0xf1a), region = 108 }
  0x88   : > { %s809_s22 = sand.u32 1, %s3524_s4  }
  0x89   : > { %s3006_s10 = smul.u32 192, %s809_s22  ;;  %s810_s26 = scalar_lea.sflag [#allocation4], %s809_s22 }
  0x8b   : > { %s3870_s16 = scalar_lea.vmem [#allocation3], %s3006_s10 }
  0x8c   : > { %3487 = dma.done.wait (%p3745_p3), %s810_s26, 3072  }
  0x8d   : > { %3489 = vsyncadd (%p3745_p3), %s810_s26, 4294964224  ;;  %s818_s9 = sand.u32 1, %s3735_s25   ;;  %s2679_s29 = sshll.u32 %s809_s22, 7 }
  0x8e   : > { %s819_s13 = scalar_lea.sflag [#allocation7], %s818_s9  ;;  %s3877_s18 = scalar_lea.vmem [#allocation6], %s2679_s29 }
  0x8f   : > { %4337 = sst [smem:[#allocation32_spill]] %s3877_s18 }
  0x90   : > { %3491 = dma.done.wait (%p3745_p3), %s819_s13, 2048  }
  0x91   : > { %3493 = vsyncadd (%p3745_p3), %s819_s13, 4294965248  ;;  %p4338_p11 = scmp.eq.s32.totalorder %s3735_s25, 0 }
  0x93   : > { %3495 = dma.done.wait (%p4338_p11), [#allocation7], 1024   ;;  %p4339_p8 = pmov %p4338_p11 }
  0x95   : > { %3497 = vsyncadd (%p4339_p8), [#allocation7], 4294966272  ;;  %p4340_p10 = pmov %p4339_p8 }
  0x96   : > { %p4341_p13 = pmov %p4339_p8 }
  0x97   : > { %3499 = dma.done.wait (%p4340_p10), [#allocation10], 2048  }
  0x98   : > { %3501 = vsyncadd (%p4341_p13), [#allocation10], 4294965248  ;;  %p942_p6 = scmp.lt.s32.totalorder %s3536_s1, 1  ;;  %p949_p3 = scmp.lt.s32.totalorder %s3532_s23, 1 }
  0x99   : > { %s4343_s15 = sld [smem:[#allocation33_spill]]  ;;  %s4353_s6 = sand.u32 1, %s3512_s28  }
  0x9a   : > { %s3895_s27 = scalar_select %p942_p6, %s3536_s1, 1 }
  0x9b   : > { %s3898_s20 = scalar_select %p949_p3, %s3532_s23, 1 }
  0x9c   : > { %s2683_s25 = sshll.u32 %s3895_s27, 3  ;;  %s4344_s13 = sld [smem:[#allocation38_spill]] }
  0x9d   : > { %s3007_s19 = smul.u32 3, %s3898_s20  ;;  %s2798_s14 = sshll.u32 %s3898_s20, 6 }
  0x9e   : > { %s4345_s21 = sld [smem:[#allocation39_spill]]  ;;  %s2799_s22 = sshll.u32 %s3898_s20, 7 }
  0x9f   : > { %s945_s24 = scalar_lea.vmem %s4343_s15, %s2683_s25  ;;  %s2688_s10 = sshll.u32 %s3898_s20, 1 }
  0xa0   : > { %s4348_s9 = sld [smem:[#allocation42_spill]]  ;;  %s3958_s26 = scalar_lea.vmem [#allocation12], %s4353_s6 }
  0xa1   : > { %s4349_s12 = sld [smem:[#allocation43_spill]]  ;;  %p2689_p1 = scmp.ne.s32.totalorder %s3532_s23, 0 }
  0xa2   : > { %s3917_s30 = scalar_lea.vmem %s4344_s13, %s3007_s19  ;;  %s4350_s11 = sld [smem:[#allocation45_spill]] }
  0xa3   : > { %s4351_s0 = sld [smem:[#allocation46_spill]] }
  0xa4   : > { %s3922_s17 = scalar_lea.vmem %s4345_s21, %s2798_s14  ;;  %s4352_s8 = sld [smem:[#allocation47_spill]] }
  0xa5   : > { %s4354_s1 = sld [smem:[#allocation35_spill]] (!%p2689_p1) }
  0xa6   : > { %s3937_s19 = scalar_lea.vmem %s4348_s9, %s2799_s22  ;;  %989 = sbr.rel (%p2689_p1) target bundleno = 479 (0x1df), region = 132 }
  0xa7   : > { %s3942_s14 = scalar_lea.vmem %s4349_s12, %s2688_s10  ;;  %s4355_s10 = sld [smem:[#allocation36_spill]] (!%p2689_p1) }
  0xa8   : > { %s978_s2 = scalar_lea.vmem %s4350_s11, %s3898_s20 }
  0xa9   : > { %s981_s5 = scalar_lea.vmem %s4351_s0, %s3898_s20 }
  0xaa   : > { %s984_s18 = scalar_lea.vmem %s4352_s8, %s3898_s20 }
  0xab   : > { %v990_v0 = vld [vmem:[%s945_s24] sm:$0xff] }
  0xac   : > { %993 = vadd.xlane.f32.xlu0 %v990_v0  ;;  %v2690_v9 = vld [vmem:[%s4354_s1] ss:$0 sm:$0xff] }
  0xad   : > { %v2691_v11 = vld [vmem:[%s4355_s10] ss:$0 sm:$0xff] }
 0x135   : > { %v994_v1 = vpop.xlane.xlu0 %993 }
 0x136   : > { %v996_v2 = vmul.f32 0.0078125, %v994_v1 }
 0x138   : > { %v997_v3 = vsub.f32 %v990_v0, %v996_v2 }
 0x13a   : > { %v998_v4 = vmul.f32 %v997_v3, %v997_v3 }
 0x13c   : > { %999 = vadd.xlane.f32.xlu0 %v998_v4 }
 0x1c5   : > { %v1000_v5 = vpop.xlane.xlu0 %999 }
 0x1c6   : > { %v1001_v6 = vmul.f32 0.0078125, %v1000_v5 }
 0x1c8   : > { %v1002_v7 = vadd.f32 1e-05, %v1001_v6 }
 0x1ca   : > { %3156 = vrsqrt.f32 %v1002_v7 }
 0x1d7   : > { %v3157_v8 = vpop.eup %3156 }
 0x1d8   : > { %v1004_v10 = vmul.f32 %v3157_v8, %v997_v3 }
 0x1da   : > { %v1011_v12 = vmul.f32 %v2690_v9, %v1004_v10 }
 0x1dc   : > { %v1018_v13 = vadd.f32 %v2691_v11, %v1011_v12 }
 0x1de   : > { %1019 = vst [vmem:[#allocation2] sm:$0xff] %v1018_v13 }
 0x1df PF: > { %v3158_v14 = vld [vmem:[%s3870_s16 + $0xac] ss:$12 sps:$4 sm:$0xff]   ;;  %v3160_v15 = vld [vmem:[%s3870_s16 + $0xa8] ss:$12 sps:$4 sm:$0xff]   ;;  %v3559_v16 = vmov 0   ;;  %v3560_v17 = vmov 0.0   ;;  %v1056_v42 = vlaneseq  ;;  %s4358_s12 = scalar_lea.vmem %s4252_s7, %s3898_s20 }
 0x1e0   : > { %1231 = vmatprep.mubr.bf16.mxu0 %v3559_v16  ;;  %2876 = vmatprep.subr.bf16.mxu1 %v3560_v17  ;;  %v3161_v18 = vld [vmem:[%s3870_s16 + $0x94] ss:$12 sps:$4 sm:$0xff]   ;;  %v3163_v19 = vld [vmem:[%s3870_s16 + $0x90] ss:$12 sps:$4 sm:$0xff]   ;;  %v3166_v21 = vld [vmem:[%s3870_s16 + $0x78] ss:$12 sps:$4 sm:$0xff]  }
 0x1e1   : > { %1199 = vmatprep.subr.bf16.mxu0 %v3158_v14  ;;  %v3164_v20 = vld [vmem:[%s3870_s16 + $0x7c] ss:$12 sps:$4 sm:$0xff]   ;;  %v3167_v22 = vld [vmem:[%s3870_s16 + $0x64] ss:$12 sps:$4 sm:$0xff]   ;;  %v3169_v23 = vld [vmem:[%s3870_s16 + $0x60] ss:$12 sps:$4 sm:$0xff]  }
 0x1e2   : > { %1200 = vmatpush1.bf16.msra.mxu0 %v3160_v15  ;;  %v3182_v24 = vld [vmem:[%s3870_s16 + $0xb0] ss:$12 sps:$4 sm:$0xff]   ;;  %v3170_v25 = vld [vmem:[%s3870_s16 + $0x4c] ss:$12 sps:$4 sm:$0xff]   ;;  %v3172_v27 = vld [vmem:[%s3870_s16 + $0x48] ss:$12 sps:$4 sm:$0xff]  }
 0x1e3   : > { %1201 = vmatprep.subr.bf16.mxu0 %v3161_v18  ;;  %2877 = vmatpush3.bf16.msra.mxu1 %v3182_v24  ;;  %v3183_v26 = vld [vmem:[%s3870_s16 + $0x98] ss:$12 sps:$4 sm:$0xff]   ;;  %v3173_v28 = vld [vmem:[%s3870_s16 + $0x34] ss:$12 sps:$4 sm:$0xff]   ;;  %v3175_v29 = vld [vmem:[%s3870_s16 + $0x30] ss:$12 sps:$4 sm:$0xff]  }
 0x1e4   : > { %2878 = vmatprep.subr.bf16.mxu1 %v3560_v17  ;;  %v3184_v30 = vld [vmem:[%s3870_s16 + $0x80] ss:$12 sps:$4 sm:$0xff]   ;;  %v3176_v31 = vld [vmem:[%s3870_s16 + $0x1c] ss:$12 sps:$4 sm:$0xff]   ;;  %v3178_v33 = vld [vmem:[%s3870_s16 + $0x18] ss:$12 sps:$4 sm:$0xff]  }
 0x1e5   : > { %v3185_v32 = vld [vmem:[%s3870_s16 + $0x68] ss:$12 sps:$4 sm:$0xff]   ;;  %v3179_v34 = vld [vmem:[%s3870_s16 + $0x4] ss:$12 sps:$4 sm:$0xff]   ;;  %v3181_v36 = vld [vmem:[%s3870_s16] ss:$12 sps:$4 sm:$0xff]  }
 0x1e6   : > { %1202 = vmatpush1.bf16.msra.mxu0 %v3163_v19  ;;  %v3186_v35 = vld [vmem:[%s3870_s16 + $0x50] ss:$12 sps:$4 sm:$0xff]   ;;  %v3187_v38 = vld [vmem:[%s3870_s16 + $0x38] ss:$12 sps:$4 sm:$0xff]   ;;  %v3188_v40 = vld [vmem:[%s3870_s16 + $0x20] ss:$12 sps:$4 sm:$0xff]  }
 0x1e7   : > { %1203 = vmatprep.subr.bf16.mxu0 %v3164_v20  ;;  %2879 = vmatpush3.bf16.msra.mxu1 %v3183_v26  ;;  %v3993_v37 = vld [vmem:[#allocation2] sm:$0xff]  ;;  %v3189_v41 = vld [vmem:[%s3870_s16 + $0x8] ss:$12 sps:$4 sm:$0xff]   ;;  %vm3561_vm0 = vmmov 0   ;;  %v4012_v43 = vshrl.u32 %v1056_v42, 7  ;;  %vm1284_vm1 = vcmask 523264  }
 0x1e8   : > { %2880 = vmatprep.subr.bf16.mxu1 %v3560_v17  ;;  %v1053_v39 = vpack.c.bf16 %v3993_v37, %v3993_v37  ;;  %2892 = vmatprep.mubr.msk.bf16.mxu1 %vm3561_vm0, %v3560_v17  ;;  %v1054_v46 = vld [vmem:[%s3917_s30] sm:$0x7]  ;;  %s3562_s16 = smov 64   ;;  %vm1356_vm2 = vcmask 1043456   ;;  %s4356_s9 = sld [smem:[#allocation34_spill]]  ;;  %vm1339_vm3 = vcmask 64512  }
 0x1e9   : > { %v1062_v44 = vsub.s32 1, %v4012_v43  ;;  %v1058_v45 = vsub.s32 0, %v4012_v43  ;;  %v1066_v58 = vsub.s32 2, %v4012_v43  ;;  %v3190_v18 = vld [vmem:[%s3922_s17 + $0x18] sm:$0xff]   ;;  %v3191_v19 = vld [vmem:[%s3922_s17 + $0x10] sm:$0xff]   ;;  %v3192_v20 = vld [vmem:[%s3922_s17 + $0x8] sm:$0xff]  }
 0x1ea   : > { %1204 = vmatpush1.bf16.msra.mxu0 %v3166_v21  ;;  %s4360_s11 = sld [smem:[#allocation40_spill]]  ;;  %p2769_p0 = scmp.ne.s32.totalorder %s3532_s23, 1 }
 0x1eb   : > { %1205 = vmatprep.subr.bf16.mxu0 %v3167_v22  ;;  %2881 = vmatpush3.bf16.msra.mxu1 %v3184_v30  ;;  %v1063_v47 = vrot.slane %v1054_v46, %v1062_v44  ;;  %v1059_v49 = vrot.slane %v1054_v46, %v1058_v45  ;;  %v1067_v59 = vrot.slane %v1054_v46, %v1066_v58  ;;  %v3196_v58 = vld [vmem:[%s3922_s17 + $0x28] sm:$0xff]   ;;  %s4362_s6 = sld [smem:[#allocation41_spill]] }
 0x1ec   : > { %2882 = vmatprep.subr.bf16.mxu1 %v3560_v17  ;;  %s4369_s13 = sld [smem:[#allocation53_spill]] (!%p2769_p0) }
 0x1ee   : > { %1206 = vmatpush1.bf16.msra.mxu0 %v3169_v23  ;;  %s4357_s29 = scalar_lea.vmem %s4356_s9, %s3895_s27  ;;  %s4368_s9 = sld [smem:[#allocation51_spill]] (!%p2769_p0) }
 0x1ef   : > { %1207 = vmatprep.subr.bf16.mxu0 %v3170_v25  ;;  %2883 = vmatpush3.bf16.msra.mxu1 %v3185_v32  ;;  %v2717_v4 = vld [vmem:[%s4357_s29] ss:$0 sm:$0xff] }
 0x1f0   : > { %2884 = vmatprep.subr.bf16.mxu1 %v3560_v17  ;;  %s4361_s0 = scalar_lea.vmem %s4360_s11, %s3898_s20 }
 0x1f1   : > { %s4363_s4 = scalar_lea.vmem %s4362_s6, %s3898_s20  ;;  %s4367_s20 = sld [smem:[#allocation49_spill]] (!%p2769_p0) }
 0x1f2   : > { %1208 = vmatpush1.bf16.msra.mxu0 %v3172_v27 }
 0x1f3   : > { %1209 = vmatprep.subr.bf16.mxu0 %v3173_v28  ;;  %2885 = vmatpush3.bf16.msra.mxu1 %v3186_v35  ;;  %v3193_v28 = vld [vmem:[%s3922_s17] sm:$0xff]  }
 0x1f4   : > { %2886 = vmatprep.subr.bf16.mxu1 %v3560_v17 }
 0x1f6   : > { %1210 = vmatpush1.bf16.msra.mxu0 %v3175_v29 }
 0x1f7   : > { %1211 = vmatprep.subr.bf16.mxu0 %v3176_v31  ;;  %2887 = vmatpush3.bf16.msra.mxu1 %v3187_v38 }
 0x1f8   : > { %2888 = vmatprep.subr.bf16.mxu1 %v3560_v17 }
 0x1fa   : > { %1212 = vmatpush1.bf16.msra.mxu0 %v3178_v33 }
 0x1fb   : > { %1213 = vmatprep.subr.bf16.mxu0 %v3179_v34  ;;  %2889 = vmatpush3.bf16.msra.mxu1 %v3188_v40 }
 0x1fc   : > { %2890 = vmatprep.subr.bf16.mxu1 %v3560_v17 }
 0x1fe   : > { %1214 = vmatpush1.bf16.msra.mxu0 %v3181_v36 }
 0x1ff   : > { %2908 = vmatprep.subr.bf16.mxu0 %v3560_v17  ;;  %2891 = vmatpush3.bf16.msra.mxu1 %v3189_v41 }
 0x200   : > { %2896 = vmatprep.subr.bf16.mxu1 %v3560_v17 }
 0x201   : > { %1232 = vmatmul.mubr.bf16.vlgmr.msra.gmra.mxu0 %v1053_v39 }
 0x202   : > { %2916 = vmatprep.mubr.msk.bf16.mxu0 %vm3561_vm0, %v3560_v17  ;;  %2893 = vmatmul.mubr.bf16.vlgmr.msra.gmra.mxu1 %v1053_v39 }
 0x203   : > { %2898 = vmatprep.mubr.msk.bf16.mxu1 %vm3561_vm0, %v3560_v17  ;;  %2909 = vmatpush3.bf16.msra.mxu0 %v3190_v18 }
 0x204   : > { %2910 = vmatprep.subr.bf16.mxu0 %v3560_v17 }
 0x207   : > { %2911 = vmatpush3.bf16.msra.mxu0 %v3191_v19 }
 0x208   : > { %2912 = vmatprep.subr.bf16.mxu0 %v3560_v17 }
 0x20b   : > { %2913 = vmatpush3.bf16.msra.mxu0 %v3192_v20  ;;  %v3206_v20 = vld [vmem:[%s3937_s19 + $0x54] ss:$8 sps:$4 sm:$0xff]  }
 0x20c   : > { %2914 = vmatprep.subr.bf16.mxu0 %v3560_v17 }
 0x20f   : > { %2915 = vmatpush3.bf16.msra.mxu0 %v3193_v28  ;;  %v3218_v28 = vld [vmem:[%s3937_s19 + $0x14] ss:$8 sps:$4 sm:$0xff]  }
 0x210   : > { %2932 = vmatprep.subr.bf16.mxu0 %v3560_v17 }
 0x2c1   : > { %v1233_v48 = vpop.f32.mrf.mxu0 }
 0x2c2   : > { %v1234_v53 = vadd.f32 %v1233_v48, %v1059_v49  ;;  %v1274_v60 = vpop.f32.mrf.mxu1 }
 0x2c3   : > { %v1235_v50 = vpop.f32.mrf.mxu0  ;;  %v1275_v61 = vadd.f32 %v1274_v60, %v1067_v59 }
 0x2c4   : > { %v1236_v51 = vadd.f32 %v1235_v50, %v1063_v47  ;;  %v1282_v57 = vpack.c.bf16 %v1234_v53, %v1234_v53  ;;  %v2894_v62 = vpop.f32.mrf.mxu1 }
 0x2c5   : > { %v1237_v52 = vpop.f32.mrf.mxu0  ;;  %v4029_v63 = vpack.c.bf16 %v1275_v61, %v1275_v61 }
 0x2c6   : > { %v1283_v54 = vpack.c.bf16 %v1236_v51, %v1236_v51  ;;  %v1277_v0 = vpop.f32.mrf.mxu1 }
 0x2c7   : > { %v1238_v55 = vpop.f32.mrf.mxu0  ;;  %v1358_v1 = vsel %vm1356_vm2, %v4029_v63, 0 }
 0x2c8   : > { %v1289_v56 = vsel %vm1284_vm1, %v1283_v54, 0  ;;  %1487 = vrot.lane.b32.xlu1 %v1283_v54, %s3562_s16  ;;  %v2895_v2 = vpop.f32.mrf.mxu1  ;;  %v3194_v55 = vld [vmem:[%s3922_s17 + $0x38] sm:$0xff]  }
 0x2c9   : > { %2897 = vmatpush3.bf16.xpose.msra.mxu1 %v1289_v56 }
 0x2ca   : > { %2902 = vmatprep.subr.bf16.mxu1 %v3560_v17 }
 0x2cc   : > { %1484 = vrot.lane.b32.xlu1 %v1282_v57, %s3562_s16 }
 0x2d0   : > { %2899 = vmatmul.mubr.msk.bf16.vlgmr.msra.gmra.mxu1 %vm1284_vm1, %v1282_v57  ;;  %v3195_v57 = vld [vmem:[%s3922_s17 + $0x30] sm:$0xff]  }
 0x2d1   : > { %2904 = vmatprep.mubr.msk.bf16.mxu1 %vm3561_vm0, %v3560_v17  ;;  %2903 = vmatpush3.bf16.msra.mxu1 %v1358_v1 }
 0x2d2   : > { %2920 = vmatprep.subr.bf16.mxu1 %v3560_v17 }
 0x33a   : > { %v1488_v24 = vpop.permute.xlu1 %1487 }
 0x33b   : > { %v1493_v26 = vsel %vm1284_vm1, %v1488_v24, 0  ;;  %v3212_v24 = vld [vmem:[%s3937_s19 + $0x34] ss:$8 sps:$4 sm:$0xff]  }
 0x33e   : > { %v1485_v27 = vpop.permute.xlu1 %1484 }
 0x390   : > { %v1325_v3 = vpop.f32.mrf.mxu1 }
 0x391   : > { %v1331_v5 = vmul.f32 0.125, %v1325_v3 }
 0x392   : > { %v2900_v6 = vpop.f32.mrf.mxu1 }
 0x393   : > { %v1338_v7 = vadd.f32 %v2717_v4, %v1331_v5 }
 0x394   : > { %v1328_v8 = vpop.f32.mrf.mxu1 }
 0x395   : > { %v1340_v9 = vsel %vm1339_vm3, %v1338_v7, -inf }
 0x396   : > { %1341 = vmax.xlane.f32.xlu0 %v1340_v9  ;;  %v2901_v10 = vpop.f32.mrf.mxu1 }
 0x41f   : > { %v1342_v11 = vpop.xlane.xlu0 %1341 }
 0x420   : > { %v1343_v12 = vsub.f32 %v1338_v7, %v1342_v11  ;;  %v3198_v11 = vld [vmem:[%s3937_s19 + $0x70] ss:$8 sps:$4 sm:$0xff]  }
 0x422   : > { %v1344_v13 = vmul.f32 1.442695, %v1343_v12  ;;  %v3200_v12 = vld [vmem:[%s3937_s19 + $0x74] ss:$8 sps:$4 sm:$0xff]  }
 0x424   : > { %3238 = vpow2.f32 %v1344_v13  ;;  %v3203_v13 = vld [vmem:[%s3937_s19 + $0x64] ss:$8 sps:$4 sm:$0xff]  }
 0x431   : > { %v3239_v14 = vpop.eup %3238 }
 0x432   : > { %v1346_v15 = vsel %vm1339_vm3, %v3239_v14, 0.0 }
 0x433   : > { %1347 = vadd.xlane.f32.xlu0 %v1346_v15 }
 0x4bc   : > { %v1348_v21 = vpop.xlane.xlu0 %1347 }
 0x4bd   : > { %3240 = vrcp.f32 %v1348_v21  ;;  %v3204_v21 = vld [vmem:[%s3937_s19 + $0x50] ss:$8 sps:$4 sm:$0xff]  }
 0x4ca   : > { %v3241_v22 = vpop.eup %3240 }
 0x4cb   : > { %v1350_v23 = vmul.f32 %v3241_v22, %v3239_v14  ;;  %v3201_v14 = vld [vmem:[%s3937_s19 + $0x60] ss:$8 sps:$4 sm:$0xff]  }
 0x4cc   : > { %v3207_v22 = vld [vmem:[%s3937_s19 + $0x40] ss:$8 sps:$4 sm:$0xff]  }
 0x4cd   : > { %v1352_v25 = vpack.c.bf16 %v1350_v23, %v1350_v23  ;;  %v3209_v23 = vld [vmem:[%s3937_s19 + $0x44] ss:$8 sps:$4 sm:$0xff]  }
 0x4cf   : > { %2905 = vmatmul.mubr.msk.bf16.vlgmr.msra.gmra.mxu1 %vm1339_vm3, %v1352_v25  ;;  %v3210_v25 = vld [vmem:[%s3937_s19 + $0x30] ss:$8 sps:$4 sm:$0xff]  }
 0x4d0   : > { %2921 = vmatpush3.bf16.xpose.msra.mxu1 %v1493_v26  ;;  %2922 = vmatprep.mubr.msk.bf16.mxu1 %vm3561_vm0, %v3560_v17  ;;  %v3215_v26 = vld [vmem:[%s3937_s19 + $0x24] ss:$8 sps:$4 sm:$0xff]  }
 0x4d1   : > { %2926 = vmatprep.subr.bf16.mxu1 %v3560_v17 }
 0x4d7   : > { %2923 = vmatmul.mubr.msk.bf16.vlgmr.msra.gmra.mxu1 %vm1284_vm1, %v1485_v27  ;;  %v3213_v27 = vld [vmem:[%s3937_s19 + $0x20] ss:$8 sps:$4 sm:$0xff]  }
 0x4d8   : > { %2928 = vmatprep.mubr.msk.bf16.mxu1 %vm3561_vm0, %v3560_v17 }
 0x58f   : > { %v1394_v29 = vpop.f32.mrf.mxu1 }
 0x590   : > { %v1408_v30 = vpack.c.bf16 %v1394_v29, %v1394_v29  ;;  %v3216_v29 = vld [vmem:[%s3937_s19 + $0x10] ss:$8 sps:$4 sm:$0xff]  }
 0x591   : > { %v2906_v31 = vpop.f32.mrf.mxu1 }
 0x592   : > { %2917 = vmatmul.mubr.msk.bf16.vlgmr.msra.gmra.mxu0 %vm1284_vm1, %v1408_v30  ;;  %v3221_v30 = vld [vmem:[%s3937_s19 + $0x4] ss:$8 sps:$4 sm:$0xff]   ;;  %v3219_v31 = vld [vmem:[%s3937_s19] ss:$8 sps:$4 sm:$0xff]  }
 0x593   : > { %v1397_v32 = vpop.f32.mrf.mxu1  ;;  %2940 = vmatprep.mubr.msk.bf16.mxu0 %vm3561_vm0, %v3560_v17  ;;  %2933 = vmatpush3.bf16.msra.mxu0 %v3194_v55 }
 0x594   : > { %2934 = vmatprep.subr.bf16.mxu0 %v3560_v17 }
 0x595   : > { %v2907_v33 = vpop.f32.mrf.mxu1 }
 0x597   : > { %v1529_v34 = vpop.f32.mrf.mxu1  ;;  %2935 = vmatpush3.bf16.msra.mxu0 %v3195_v57 }
 0x598   : > { %v1535_v35 = vmul.f32 0.125, %v1529_v34  ;;  %2936 = vmatprep.subr.bf16.mxu0 %v3560_v17 }
 0x599   : > { %v2924_v36 = vpop.f32.mrf.mxu1 }
 0x59a   : > { %v1536_v38 = vadd.f32 %v2717_v4, %v1535_v35  ;;  %v2724_v4 = vld [vmem:[%s4358_s12] ss:$0 sm:$0xff] }
 0x59b   : > { %v1532_v39 = vpop.f32.mrf.mxu1  ;;  %2937 = vmatpush3.bf16.msra.mxu0 %v3196_v58  ;;  %v2732_v36 = vld [vmem:[%s4361_s0] ss:$0 sm:$0xff] }
 0x59c   : > { %v1537_v40 = vsel %vm1339_vm3, %v1536_v38, -inf  ;;  %2938 = vmatprep.subr.bf16.mxu0 %v3560_v17  ;;  %v2733_v39 = vld [vmem:[%s4363_s4] ss:$0 sm:$0xff] }
 0x59d   : > { %1538 = vmax.xlane.f32.xlu0 %v1537_v40  ;;  %v2925_v41 = vpop.f32.mrf.mxu1 }
 0x5b3   : > { %1550 = vrot.lane.b32.xlu0 %v4029_v63, %s3562_s16  ;;  %v3197_v63 = vld [vmem:[%s3922_s17 + $0x20] sm:$0xff]   ;;  %s4359_s17 = sld [smem:[#allocation32_spill]] }
 0x5b4   : > { %2939 = vmatpush3.bf16.msra.mxu0 %v3197_v63 }
 0x5b9   : > { %v3231_v55 = vld [vmem:[%s4359_s17 + $0x18] sm:$0xff]   ;;  %v3233_v57 = vld [vmem:[%s4359_s17 + $0x10] sm:$0xff]   ;;  %v3234_v58 = vld [vmem:[%s4359_s17 + $0x48] sm:$0xff]  }
 0x626   : > { %v1539_v42 = vpop.xlane.xlu0 %1538 }
 0x627   : > { %v1540_v46 = vsub.f32 %v1536_v38, %v1539_v42 }
 0x629   : > { %v1541_v47 = vmul.f32 1.442695, %v1540_v46  ;;  %v3222_v46 = vld [vmem:[%s4359_s17 + $0x78] sm:$0xff]  }
 0x62a   : > { %v1551_v48 = vpop.permute.xlu0 %1550  ;;  %2827 = vmatprep.subr.bf16.mxu0 %v3222_v46 }
 0x62b   : > { %3242 = vpow2.f32 %v1541_v47  ;;  %v1556_v49 = vsel %vm1356_vm2, %v1551_v48, 0  ;;  %v3223_v47 = vld [vmem:[%s4359_s17 + $0x38] sm:$0xff]   ;;  %v3224_v48 = vld [vmem:[%s4359_s17 + $0x70] sm:$0xff]  }
 0x62c   : > { %2927 = vmatpush3.bf16.msra.mxu1 %v1556_v49  ;;  %v3225_v49 = vld [vmem:[%s4359_s17 + $0x30] sm:$0xff]  }
 0x62d   : > { %1813 = vmatprep.subr.bf16.mxu1 %v3200_v12 }
 0x638   : > { %v3243_v50 = vpop.eup %3242 }
 0x639   : > { %v1543_v51 = vsel %vm1339_vm3, %v3243_v50, 0.0 }
 0x63a   : > { %1544 = vadd.xlane.f32.xlu1 %v1543_v51  ;;  %v3227_v51 = vld [vmem:[%s4359_s17 + $0x28] sm:$0xff]  }
 0x652   : > { %v1470_v52 = vpop.f32.mrf.mxu0 }
 0x653   : > { %v1482_v5 = vadd.f32 %v2724_v4, %v1470_v52  ;;  %v3228_v52 = vld [vmem:[%s4359_s17 + $0x60] sm:$0xff]  }
 0x654   : > { %v2918_v53 = vpop.f32.mrf.mxu0 }
 0x655   : > { %v3229_v53 = vld [vmem:[%s4359_s17 + $0x20] sm:$0xff]  }
 0x656   : > { %v1473_v54 = vpop.f32.mrf.mxu0 }
 0x657   : > { %v3230_v54 = vld [vmem:[%s4359_s17 + $0x58] sm:$0xff]  }
 0x658   : > { %v2919_v56 = vpop.f32.mrf.mxu0 }
 0x659   : > { %v3232_v56 = vld [vmem:[%s4359_s17 + $0x50] sm:$0xff]  }
 0x6c3   : > { %v1545_v59 = vpop.xlane.xlu1 %1544 }
 0x6c4   : > { %3244 = vrcp.f32 %v1545_v59  ;;  %v3235_v59 = vld [vmem:[%s4359_s17 + $0x8] sm:$0xff]  }
 0x6d1   : > { %v3245_v60 = vpop.eup %3244 }
 0x6d2   : > { %v1547_v61 = vmul.f32 %v3245_v60, %v3243_v50  ;;  %v3226_v50 = vld [vmem:[%s4359_s17 + $0x68] sm:$0xff]   ;;  %v3236_v60 = vld [vmem:[%s4359_s17 + $0x40] sm:$0xff]  }
 0x6d4   : > { %v1548_v62 = vpack.c.bf16 %v1547_v61, %v1547_v61  ;;  %v3237_v61 = vld [vmem:[%s4359_s17] sm:$0xff]  }
 0x6d6   : > { %2929 = vmatmul.mubr.msk.bf16.vlgmr.msra.gmra.mxu1 %vm1339_vm3, %v1548_v62  ;;  %v1721_v62 = vld [vmem:[%s3942_s14] sm:$0x3] }
 0x6d7   : > { %1845 = vmatprep.mubr.bf16.mxu1 %v3559_v16  ;;  %1814 = vmatpush1.bf16.msra.mxu1 %v3198_v11  ;;  %v1726_v63 = vrot.slane %v1721_v62, %v1058_v45 }
 0x6d8   : > { %1815 = vmatprep.subr.bf16.mxu1 %v3203_v13 }
 0x6db   : > { %1816 = vmatpush1.bf16.msra.mxu1 %v3201_v14 }
 0x6dc   : > { %1817 = vmatprep.subr.bf16.mxu1 %v3206_v20 }
 0x6df   : > { %1818 = vmatpush1.bf16.msra.mxu1 %v3204_v21 }
 0x6e0   : > { %1819 = vmatprep.subr.bf16.mxu1 %v3209_v23 }
 0x6e3   : > { %1820 = vmatpush1.bf16.msra.mxu1 %v3207_v22 }
 0x6e4   : > { %1821 = vmatprep.subr.bf16.mxu1 %v3212_v24  ;;  %v2750_v24 = vld [vmem:[%s978_s2] ss:$0 sm:$0xff] }
 0x6e7   : > { %1822 = vmatpush1.bf16.msra.mxu1 %v3210_v25 }
 0x6e8   : > { %1823 = vmatprep.subr.bf16.mxu1 %v3215_v26 }
 0x6eb   : > { %1824 = vmatpush1.bf16.msra.mxu1 %v3213_v27 }
 0x6ec   : > { %1825 = vmatprep.subr.bf16.mxu1 %v3218_v28 }
 0x6ef   : > { %1826 = vmatpush1.bf16.msra.mxu1 %v3216_v29 }
 0x6f0   : > { %1827 = vmatprep.subr.bf16.mxu1 %v3221_v30 }
 0x6f3   : > { %1828 = vmatpush1.bf16.msra.mxu1 %v3219_v31 }
 0x796   : > { %v1592_v0 = vpop.f32.mrf.mxu1 }
 0x797   : > { %v1606_v1 = vpack.c.bf16 %v1592_v0, %v1592_v0  ;;  %v1730_v0 = vrot.slane %v1721_v62, %v1062_v44 }
 0x798   : > { %v2930_v2 = vpop.f32.mrf.mxu1 }
 0x799   : > { %2941 = vmatmul.mubr.msk.bf16.vlgmr.msra.gmra.mxu0 %vm1284_vm1, %v1606_v1 }
 0x79a   : > { %v1595_v17 = vpop.f32.mrf.mxu1  ;;  %2828 = vmatpush3.bf16.msra.mxu0 %v3223_v47 }
 0x79b   : > { %2829 = vmatprep.subr.bf16.mxu0 %v3224_v48 }
 0x79c   : > { %v2931_v3 = vpop.f32.mrf.mxu1 }
 0x79e   : > { %2830 = vmatpush3.bf16.msra.mxu0 %v3225_v49 }
 0x79f   : > { %2831 = vmatprep.subr.bf16.mxu0 %v3226_v50 }
 0x7a2   : > { %2832 = vmatpush3.bf16.msra.mxu0 %v3227_v51 }
 0x7a3   : > { %2833 = vmatprep.subr.bf16.mxu0 %v3228_v52 }
 0x7a6   : > { %2834 = vmatpush3.bf16.msra.mxu0 %v3229_v53 }
 0x7a7   : > { %2835 = vmatprep.subr.bf16.mxu0 %v3230_v54 }
 0x7aa   : > { %2836 = vmatpush3.bf16.msra.mxu0 %v3231_v55 }
 0x7ab   : > { %2837 = vmatprep.subr.bf16.mxu0 %v3232_v56 }
 0x7ae   : > { %2838 = vmatpush3.bf16.msra.mxu0 %v3233_v57 }
 0x7af   : > { %2839 = vmatprep.subr.bf16.mxu0 %v3234_v58 }
 0x7b2   : > { %2840 = vmatpush3.bf16.msra.mxu0 %v3235_v59 }
 0x7b3   : > { %2841 = vmatprep.subr.bf16.mxu0 %v3236_v60 }
 0x7b6   : > { %2842 = vmatpush3.bf16.msra.mxu0 %v3237_v61 }
 0x859   : > { %v1668_v16 = vpop.f32.mrf.mxu0 }
 0x85a   : > { %v1674_v6 = vadd.f32 %v1668_v16, %v1482_v5 }
 0x85b   : > { %v2942_v7 = vpop.f32.mrf.mxu0 }
 0x85c   : > { %v1675_v8 = vadd.f32 %v1674_v6, %v3993_v37 }
 0x85d   : > { %v1671_v9 = vpop.f32.mrf.mxu0 }
 0x85e   : > { %1678 = vadd.xlane.f32.xlu0 %v1675_v8 }
 0x85f   : > { %v2943_v10 = vpop.f32.mrf.mxu0 }
 0x8e7   : > { %v1679_v15 = vpop.xlane.xlu0 %1678 }
 0x8e8   : > { %v1681_v37 = vmul.f32 0.0078125, %v1679_v15 }
 0x8ea   : > { %v1682_v18 = vsub.f32 %v1675_v8, %v1681_v37 }
 0x8ec   : > { %v1683_v19 = vmul.f32 %v1682_v18, %v1682_v18 }
 0x8ee   : > { %1684 = vadd.xlane.f32.xlu1 %v1683_v19 }
 0x977   : > { %v1685_v32 = vpop.xlane.xlu1 %1684 }
 0x978   : > { %v1686_v33 = vmul.f32 0.0078125, %v1685_v32 }
 0x97a   : > { %v1687_v34 = vadd.f32 1e-05, %v1686_v33 }
 0x97c   : > { %3246 = vrsqrt.f32 %v1687_v34 }
 0x989   : > { %v3247_v35 = vpop.eup %3246 }
 0x98a   : > { %v1689_v38 = vmul.f32 %v3247_v35, %v1682_v18 }
 0x98c   : > { %v1696_v40 = vmul.f32 %v2732_v36, %v1689_v38 }
 0x98e   : > { %v4107_v41 = vadd.f32 %v2733_v39, %v1696_v40  ;;  %v2767_v40 = vld [vmem:[%s981_s5] ss:$0 sm:$0xff] }
 0x990   : > { %v1720_v42 = vpack.c.bf16 %v4107_v41, %v4107_v41 }
 0x992   : > { %1846 = vmatmul.mubr.bf16.vlgmr.msra.gmra.mxu1 %v1720_v42 }
 0xa52   : > { %v1847_v1 = vpop.f32.mrf.mxu1 }
 0xa53   : > { %v1848_v2 = vadd.f32 %v1847_v1, %v1726_v63 }
 0xa54   : > { %v1849_v17 = vpop.f32.mrf.mxu1 }
 0xa55   : > { %v1856_v3 = vmul.f32 0.044715, %v1848_v2  ;;  %v1850_v4 = vadd.f32 %v1849_v17, %v1730_v0  ;;  %v1854_v15 = vmul.f32 0.5, %v1848_v2 }
 0xa56   : > { %v1851_v5 = vpop.f32.mrf.mxu1 }
 0xa57   : > { %v1858_v16 = vmul.f32 %v1856_v3, %v1848_v2  ;;  %v1857_v6 = vmul.f32 0.044715, %v1850_v4  ;;  %v1855_v37 = vmul.f32 0.5, %v1850_v4 }
 0xa58   : > { %v1852_v7 = vpop.f32.mrf.mxu1 }
 0xa59   : > { %v1860_v8 = vmul.f32 %v1858_v16, %v1848_v2  ;;  %v1859_v9 = vmul.f32 %v1857_v6, %v1850_v4 }
 0xa5b   : > { %v1862_v10 = vadd.f32 %v1860_v8, %v1848_v2  ;;  %v1861_v11 = vmul.f32 %v1859_v9, %v1850_v4 }
 0xa5d   : > { %v1864_v12 = vmul.f32 0.7978846, %v1862_v10  ;;  %v1863_v13 = vadd.f32 %v1861_v11, %v1850_v4 }
 0xa5f   : > { %v1865_v14 = vmul.f32 0.7978846, %v1863_v13  ;;  %3248 = vtanh.f32 %v1864_v12 }
 0xa61   : > { %3250 = vtanh.f32 %v1865_v14 }
 0xa6c   : > { %v3249_v43 = vpop.eup %3248 }
 0xa6d   : > { %v1868_v44 = vadd.f32 1.0, %v3249_v43 }
 0xa6e   : > { %v3251_v45 = vpop.eup %3250 }
 0xa6f   : > { %v1869_v18 = vadd.f32 1.0, %v3251_v45  ;;  %v1870_v19 = vmul.f32 %v1868_v44, %v1854_v15 }
 0xa71   : > { %v1871_v20 = vmul.f32 %v1869_v18, %v1855_v37  ;;  %v1904_v22 = vpack.c.bf16 %v1870_v19, %v1870_v19 }
 0xa73   : > { %v1905_v21 = vpack.c.bf16 %v1871_v20, %v1871_v20 }
 0xa75   : > { %2041 = vmatprep.mubr.bf16.mxu0 %v1905_v21 }
 0xa76   : > { %2042 = vmatmul.mubr.bf16.vlgmr.msra.gmra.mxu0 %v1904_v22 }
 0xb36   : > { %v2843_v23 = vpop.f32.mrf.mxu0 }
 0xb38   : > { %v2844_v25 = vpop.f32.mrf.mxu0 }
 0xb39   : > { %v2845_v26 = vadd.f32 %v2844_v25, %v2843_v23 }
 0xb3a   : > { %v2846_v27 = vpop.f32.mrf.mxu0 }
 0xb3b   : > { %v2044_v28 = vadd.f32 %v2845_v26, %v2750_v24 }
 0xb3c   : > { %v2847_v29 = vpop.f32.mrf.mxu0 }
 0xb3d   : > { %v2049_v30 = vadd.f32 %v2044_v28, %v4107_v41  ;;  %v2768_v41 = vld [vmem:[%s984_s18] ss:$0 sm:$0xff] }
 0xb3f   : > { %2052 = vadd.xlane.f32.xlu1 %v2049_v30 }
 0xbc8   : > { %v2053_v31 = vpop.xlane.xlu1 %2052 }
 0xbc9   : > { %v2054_v32 = vmul.f32 0.0078125, %v2053_v31 }
 0xbcb   : > { %v2055_v33 = vsub.f32 %v2049_v30, %v2054_v32 }
 0xbcd   : > { %v2056_v34 = vmul.f32 %v2055_v33, %v2055_v33 }
 0xbcf   : > { %2057 = vadd.xlane.f32.xlu1 %v2056_v34 }
 0xc58   : > { %v2058_v35 = vpop.xlane.xlu1 %2057 }
 0xc59   : > { %v2059_v36 = vmul.f32 0.0078125, %v2058_v35 }
 0xc5b   : > { %v2060_v38 = vadd.f32 1e-05, %v2059_v36 }
 0xc5d   : > { %3252 = vrsqrt.f32 %v2060_v38 }
 0xc6a   : > { %v3253_v39 = vpop.eup %3252 }
 0xc6b   : > { %v2062_v42 = vmul.f32 %v3253_v39, %v2055_v33 }
 0xc6d   : > { %v2069_v46 = vmul.f32 %v2767_v40, %v2062_v42  ;;  %2081 = sbr.rel (%p2769_p0) target bundleno = 3840 (0xf00), region = 136 }
 0xc6f   : > { %v2076_v47 = vadd.f32 %v2768_v41, %v2069_v46 }
 0xc71   : > { %2077 = vst [vmem:[#allocation2] sm:$0xff] %v2076_v47 }
 0xc72   : > { %v3254_v48 = vld [vmem:[#allocation8 + $0x38] sm:$0xff]   ;;  %v3563_v49 = vmov 0.0   ;;  %v3255_v50 = vld [vmem:[#allocation8 + $0x30] sm:$0xff]   ;;  %vm3564_vm4 = vmmov 0   ;;  %v3256_v51 = vld [vmem:[#allocation8 + $0x28] sm:$0xff]   ;;  %v2098_v60 = vpack.c.bf16 %v2076_v47, %v2076_v47 }
 0xc73   : > { %2944 = vmatprep.subr.bf16.mxu0 %v3563_v49  ;;  %2964 = vmatprep.subr.bf16.mxu1 %v3563_v49  ;;  %v3262_v52 = vld [vmem:[#allocation9 + $0x38] sm:$0xff]   ;;  %v3257_v53 = vld [vmem:[#allocation8 + $0x20] sm:$0xff]   ;;  %v3263_v54 = vld [vmem:[#allocation9 + $0x30] sm:$0xff]  }
 0xc74   : > { %2945 = vmatpush3.bf16.msra.mxu0 %v3254_v48  ;;  %2960 = vmatprep.mubr.msk.bf16.mxu0 %vm3564_vm4, %v3563_v49  ;;  %v3258_v55 = vld [vmem:[#allocation8 + $0x18] sm:$0xff]   ;;  %v3264_v56 = vld [vmem:[#allocation9 + $0x28] sm:$0xff]   ;;  %v3259_v57 = vld [vmem:[#allocation8 + $0x10] sm:$0xff]  }
 0xc75   : > { %2946 = vmatprep.subr.bf16.mxu0 %v3563_v49  ;;  %2980 = vmatprep.mubr.msk.bf16.mxu1 %vm3564_vm4, %v3563_v49  ;;  %v3260_v58 = vld [vmem:[#allocation8 + $0x8] sm:$0xff]   ;;  %v3261_v59 = vld [vmem:[#allocation8] sm:$0xff]   ;;  %v3266_v62 = vld [vmem:[#allocation9 + $0x18] sm:$0xff]  }
 0xc76   : > { %2965 = vmatpush3.bf16.msra.mxu1 %v3262_v52  ;;  %v3265_v61 = vld [vmem:[#allocation9 + $0x20] sm:$0xff]   ;;  %v3267_v63 = vld [vmem:[#allocation9 + $0x10] sm:$0xff]   ;;  %v3268_v0 = vld [vmem:[#allocation9 + $0x8] sm:$0xff]  }
 0xc77   : > { %2966 = vmatprep.subr.bf16.mxu1 %v3563_v49  ;;  %v3269_v1 = vld [vmem:[#allocation9] sm:$0xff]   ;;  %v3270_v2 = vld [vmem:[#allocation11 + $0x38] sm:$0xff]   ;;  %v3271_v17 = vld [vmem:[#allocation11 + $0x30] sm:$0xff]  }
 0xc78   : > { %2947 = vmatpush3.bf16.msra.mxu0 %v3255_v50  ;;  %v3272_v3 = vld [vmem:[#allocation11 + $0x28] sm:$0xff]   ;;  %v2099_v4 = vld [vmem:[%s4367_s20] sm:$0x1]  ;;  %v3273_v11 = vld [vmem:[#allocation11 + $0x20] sm:$0xff]  }
 0xc79   : > { %2948 = vmatprep.subr.bf16.mxu0 %v3563_v49  ;;  %v3274_v12 = vld [vmem:[#allocation11 + $0x18] sm:$0xff]   ;;  %v3275_v13 = vld [vmem:[#allocation11 + $0x10] sm:$0xff]   ;;  %v3276_v14 = vld [vmem:[#allocation11 + $0x8] sm:$0xff]  }
 0xc7a   : > { %2967 = vmatpush3.bf16.msra.mxu1 %v3263_v54  ;;  %v3277_v43 = vld [vmem:[#allocation11] sm:$0xff]   ;;  %v2206_v44 = vld [vmem:[%s4368_s9] sm:$0x1] }
 0xc7b   : > { %2968 = vmatprep.subr.bf16.mxu1 %v3563_v49  ;;  %v2313_v22 = vld [vmem:[%s4369_s13] sm:$0x1] }
 0xc7c   : > { %2949 = vmatpush3.bf16.msra.mxu0 %v3256_v51 }
 0xc7d   : > { %2950 = vmatprep.subr.bf16.mxu0 %v3563_v49 }
 0xc7e   : > { %2969 = vmatpush3.bf16.msra.mxu1 %v3264_v56 }
 0xc7f   : > { %2970 = vmatprep.subr.bf16.mxu1 %v3563_v49 }
 0xc80   : > { %2951 = vmatpush3.bf16.msra.mxu0 %v3257_v53 }
 0xc81   : > { %2952 = vmatprep.subr.bf16.mxu0 %v3563_v49 }
 0xc82   : > { %2971 = vmatpush3.bf16.msra.mxu1 %v3265_v61 }
 0xc83   : > { %2972 = vmatprep.subr.bf16.mxu1 %v3563_v49 }
 0xc84   : > { %2953 = vmatpush3.bf16.msra.mxu0 %v3258_v55 }
 0xc85   : > { %2954 = vmatprep.subr.bf16.mxu0 %v3563_v49 }
 0xc86   : > { %2973 = vmatpush3.bf16.msra.mxu1 %v3266_v62 }
 0xc87   : > { %2974 = vmatprep.subr.bf16.mxu1 %v3563_v49 }
 0xc88   : > { %2955 = vmatpush3.bf16.msra.mxu0 %v3259_v57 }
 0xc89   : > { %2956 = vmatprep.subr.bf16.mxu0 %v3563_v49 }
 0xc8a   : > { %2975 = vmatpush3.bf16.msra.mxu1 %v3267_v63 }
 0xc8b   : > { %2976 = vmatprep.subr.bf16.mxu1 %v3563_v49 }
 0xc8c   : > { %2957 = vmatpush3.bf16.msra.mxu0 %v3260_v58 }
 0xc8d   : > { %2958 = vmatprep.subr.bf16.mxu0 %v3563_v49 }
 0xc8e   : > { %2977 = vmatpush3.bf16.msra.mxu1 %v3268_v0 }
 0xc8f   : > { %2978 = vmatprep.subr.bf16.mxu1 %v3563_v49 }
 0xc90   : > { %2959 = vmatpush3.bf16.msra.mxu0 %v3261_v59 }
 0xc91   : > { %2984 = vmatprep.subr.bf16.mxu0 %v3563_v49 }
 0xc92   : > { %2979 = vmatpush3.bf16.msra.mxu1 %v3269_v1 }
 0xc93   : > { %2961 = vmatmul.mubr.bf16.vlgmr.msra.gmra.mxu0 %v2098_v60 }
 0xc94   : > { %3000 = vmatprep.mubr.msk.bf16.mxu0 %vm3564_vm4, %v3563_v49  ;;  %2985 = vmatpush3.bf16.msra.mxu0 %v3270_v2 }
 0xc95   : > { %2986 = vmatprep.subr.bf16.mxu0 %v3563_v49 }
 0xc98   : > { %2987 = vmatpush3.bf16.msra.mxu0 %v3271_v17 }
 0xc99   : > { %2988 = vmatprep.subr.bf16.mxu0 %v3563_v49 }
 0xc9c   : > { %2989 = vmatpush3.bf16.msra.mxu0 %v3272_v3 }
 0xc9d   : > { %2990 = vmatprep.subr.bf16.mxu0 %v3563_v49 }
 0xca0   : > { %2991 = vmatpush3.bf16.msra.mxu0 %v3273_v11 }
 0xca1   : > { %2992 = vmatprep.subr.bf16.mxu0 %v3563_v49 }
 0xca4   : > { %2993 = vmatpush3.bf16.msra.mxu0 %v3274_v12 }
 0xca5   : > { %2994 = vmatprep.subr.bf16.mxu0 %v3563_v49 }
 0xca8   : > { %2995 = vmatpush3.bf16.msra.mxu0 %v3275_v13 }
 0xca9   : > { %2996 = vmatprep.subr.bf16.mxu0 %v3563_v49 }
 0xcac   : > { %2997 = vmatpush3.bf16.msra.mxu0 %v3276_v14 }
 0xcad   : > { %2998 = vmatprep.subr.bf16.mxu0 %v3563_v49 }
 0xcb0   : > { %2999 = vmatpush3.bf16.msra.mxu0 %v3277_v43 }
 0xd53   : > { %v2182_v5 = vpop.f32.mrf.mxu0 }
 0xd54   : > { %v2183_v16 = vadd.f32 %v2182_v5, %v2099_v4 }
 0xd55   : > { %v2962_v6 = vpop.f32.mrf.mxu0 }
 0xd56   : > { %3278 = vtanh.f32 %v2183_v16 }
 0xd57   : > { %v2185_v7 = vpop.f32.mrf.mxu0 }
 0xd59   : > { %v2963_v8 = vpop.f32.mrf.mxu0 }
 0xd63   : > { %v3279_v9 = vpop.eup %3278 }
 0xd64   : > { %v2205_v10 = vpack.c.bf16 %v3279_v9, %v3279_v9 }
 0xd66   : > { %2981 = vmatmul.mubr.bf16.vlgmr.msra.gmra.mxu1 %v2205_v10 }
 0xe26   : > { %v2289_v45 = vpop.f32.mrf.mxu1 }
 0xe27   : > { %v2290_v15 = vadd.f32 %v2289_v45, %v2206_v44 }
 0xe28   : > { %v2982_v37 = vpop.f32.mrf.mxu1 }
 0xe29   : > { %3280 = vtanh.f32 %v2290_v15 }
 0xe2a   : > { %v2292_v18 = vpop.f32.mrf.mxu1 }
 0xe2c   : > { %v2983_v19 = vpop.f32.mrf.mxu1 }
 0xe36   : > { %v3281_v20 = vpop.eup %3280 }
 0xe37   : > { %v2312_v21 = vpack.c.bf16 %v3281_v20, %v3281_v20 }
 0xe39   : > { %3001 = vmatmul.mubr.bf16.vlgmr.msra.gmra.mxu0 %v2312_v21 }
 0xef9   : > { %v2396_v23 = vpop.f32.mrf.mxu0 }
 0xefa   : > { %v2397_v24 = vadd.f32 %v2396_v23, %v2313_v22 }
 0xefb   : > { %v3002_v25 = vpop.f32.mrf.mxu0 }
 0xefc   : > { %2402 = vst [vmem:[%s3958_s26] sm:$0x1] %v2397_v24 }
 0xefd   : > { %v2399_v26 = vpop.f32.mrf.mxu0 }
 0xeff   : > { %v3003_v27 = vpop.f32.mrf.mxu0 }
 0xf00 PF: > { %s4370_s12 = sld [smem:[#allocation22_spill]]  ;;  %s2416_s6 = sshll.u32 %s3958_s26, 4  ;;  %s2417_s6 = int_to_ptr.vmem [resolvable:$true] %s2416_s6 }
 0xf01   : > { %s4372_s0 = sld [smem:[#allocation54_spill]]  ;;  %s4374_s4 = sand.u32 1, %s3512_s28  }
 0xf02   : > { %s2404_s14 = scalar_lea.sflag [#allocation5], %s4374_s4  ;;  %s3416_s8 = scalar_lea.vmem %s2417_s6, 16 }
 0xf03   : > { %p3417_p12 = scmp.ne.s32.totalorder %s2417_s6, %s3416_s8  ;;  %s3565_s1 = smov [#allocation12]  }
 0xf04   : > { %s3420_s2 = sshll.u32 %s3565_s1, 4  ;;  %s3421_s2 = int_to_ptr.vmem [resolvable:$false] %s3420_s2 }
 0xf05   : > { %p3418_p2 = pnand %p3417_p12, %p3752_p7  ;;  %s3422_s25 = scalar_lea.vmem %s3421_s2, 32 }
 0xf06   : > { %s2794_s3 = sshll.u32 %s4370_s12, 4  ;;  %p3423_p5 = scmp.lt.s32.totalorder %s2417_s6, %s3421_s2 }
 0xf07   : > { %s4373_s15 = smov %s4372_s0  ;;  %s2414_s19 = scalar_lea.hbm %s4372_s0, %s2794_s3 }
 0xf08   : > { %p3419_p4 = pneg %p3418_p2  ;;  %p3424_p11 = scmp.lt.s32.totalorder %s3422_s25, %s3416_s8 }
 0xf0a   : > { %p3425_p8 = por %p3424_p11, %p3423_p5 }
 0xf0c   : > { %p3426_p10 = pnand %p3425_p8, %p3419_p4 }
 0xf0e   : > { %3429 = shalt.err (!%p3426_p10)
}
 0xf0f   : > { %s3430_s22 = scalar_lea.hbm %s2414_s19, 16  ;;  %s3434_s16 = scalar_lea.hbm %s4373_s15, 32 }
 0xf10   : > { %p3431_p13 = scmp.ne.s32.totalorder %s2414_s19, %s3430_s22  ;;  %p3435_p1 = scmp.lt.s32.totalorder %s2414_s19, %s4373_s15 }
 0xf11   : > { %p3436_p0 = scmp.lt.s32.totalorder %s3434_s16, %s3430_s22 }
 0xf12   : > { %p3432_p6 = pnand %p3431_p13, %p3752_p7 }
 0xf13   : > { %p3437_p12 = por %p3436_p0, %p3435_p1 }
 0xf14   : > { %p3433_p3 = pneg %p3432_p6 }
 0xf16   : > { %p3438_p2 = pnand %p3437_p12, %p3433_p3 }
 0xf18   : > { %3441 = shalt.err (!%p3438_p2)
}
 0xf19   : > { %3024 = dma.vmem_to_hbm [thread:$0]  (%p3752_p7), %s2417_s6, 16, %s2414_s19, %s2404_s14  }
 0xf1a PF: > { %s4375_s18 = sld [smem:[#allocation25_spill]] }
 0xf1b   : > { %s4376_s20 = sld [smem:[#allocation18_spill]] }
 0xf20   : > { %p3054_p4 = scmp.ge.s32.totalorder %s4375_s18, 2 }
 0xf21   : > { %s2428_s24 = sand.u32 1, %s4376_s20  }
 0xf22   : > { %p3044_p5 = pnand %p3054_p4, %p3757_p9  ;;  %s2429_s9 = scalar_lea.sflag [#allocation5], %s2428_s24 }
 0xf24   : > { %p3045_p11 = pneg %p3044_p5 }
 0xf26   : > { %3503 = dma.done.wait (%p3045_p11), %s2429_s9, 16  }
 0xf27   : > { %3505 = vsyncadd (%p3045_p11), %s2429_s9, 4294967280  ;;  %s42_s6 = sadd.s32 1, %s4375_s18   ;;  %s4378_s29 = sld [smem:[#allocation19_spill]] }
 0xf28   : > { %p39_p8 = scmp.ge.s32.totalorder %s42_s6, 6   ;;  %s4379_s27 = sld [smem:[#allocation31_spill]] }
 0xf29   : > { %s4380_s30 = sld [smem:[#allocation20_spill]]  ;;  %s4387_s3 = smov %s3512_s28 }
 0xf2a   : > { %s4381_s4 = sld [smem:[#allocation21_spill]] }
 0xf2b   : > { %s4382_s0 = sld [smem:[#allocation30_spill]]  ;;  %41 = sbr.rel (!%p39_p8) target bundleno = 35 (0x23), region = 222 }
 0xf2c   : > { %s4383_s23 = sld [smem:[#allocation23_spill]] }
 0xf2d   : > { %s4384_s1 = sld [smem:[#allocation24_spill]]  ;;  %s4388_s28 = smov %s4378_s29 }
 0xf2e   : > { %s4385_s5 = sld [smem:[#allocation28_spill]]  ;;  %s4389_s29 = smov %s4379_s27 }
 0xf2f   : > { %s4386_s24 = sld [smem:[#allocation29_spill]] }
 0xf30   :  { %2433 = vsyncpa [#allocation4], 1 }
 0xf31   :  { %2435 = vsyncpa [#allocation4 + $0x1], 1 }
 0xf32   :  { %2436 = vsyncpa [#allocation7], 1 }
 0xf33   :  { %2438 = vsyncpa [#allocation7 + $0x1], 1 }
 0xf34   :  { %2439 = vsyncpa [#allocation10], 1 }
 0xf35   :  { %2440 = vsyncpa [#allocation5], 1 }
 0xf36   :  { %2442 = vsyncpa [#allocation5 + $0x1], 1 }

</bundles_post_ra>
